<compile_context>
chip_gen: v5e
topology: v5e:2x2
jax: 0.10.0
libtpu: 0.0.40
codegen_flags: <defaults>
</compile_context>

<pallas_src>
import jax
import jax.numpy as jnp
import numpy as np
from jax import lax
from jax.experimental import pallas as pl
from jax.experimental.pallas import tpu as pltpu


# ----------------------------------------------------------------------------
# Pallas kernel: 3x3 depthwise conv + bias, NHWC, one batch element per step
# ----------------------------------------------------------------------------
def dwconv_kernel(w_ref, b_ref, x_ref, o_ref, feat_ref):
    # w_ref:    (9, C)   per-tap per-channel weights, tap = di*3 + dj   (VMEM)
    # b_ref:    (1, C)   bias                                            (VMEM)
    # x_ref:    (1, H, W, C) input block (NHWC)                          (VMEM)
    # o_ref:    (1, H, W, C) output block                                (VMEM)
    # feat_ref: (H+2, W+2, C) zero-halo scratch (fused padding)          (VMEM)
    _, H, W, C = x_ref.shape

    # Fused "padding=1": zero the halo scratch, drop the input in the middle.
    feat_ref[...] = jnp.zeros_like(feat_ref)
    feat_ref[1:H + 1, 1:W + 1, :] = x_ref[0].astype(jnp.float32)

    # Bias init, then 9 lane-dense vector MACs (one per tap).
    acc = jnp.zeros((H, W, C), jnp.float32) + b_ref[0, :]
    for di in range(3):
        for dj in range(3):
            tap = feat_ref[di:di + H, dj:dj + W, :]          # (H, W, C)
            acc = acc + tap * w_ref[di * 3 + dj, :]          # broadcast over lanes

    o_ref[0] = acc.astype(o_ref.dtype)


def dwconv_pallas(x, w, b):
    """x: (B, C, H, W) NCHW, w: (C, 1, 3, 3) depthwise OIHW, b: (C,)."""
    B, C, H, W = x.shape

    # Layout plumbing (wrapper side): channels onto the lane axis.
    x_nhwc = jnp.transpose(x, (0, 2, 3, 1)).astype(jnp.float32)      # (B, H, W, C)
    w9 = jnp.transpose(w.reshape(C, 9), (1, 0)).astype(jnp.float32)  # (9, C)
    b2 = b.reshape(1, C).astype(jnp.float32)                         # (1, C)

    out_nhwc = pl.pallas_call(
        dwconv_kernel,
        out_shape=jax.ShapeDtypeStruct((B, H, W, C), jnp.float32),
        grid=(B,),
        in_specs=[
            pl.BlockSpec((9, C), lambda bi: (0, 0)),                 # weights
            pl.BlockSpec((1, C), lambda bi: (0, 0)),                 # bias
            pl.BlockSpec((1, H, W, C), lambda bi: (bi, 0, 0, 0)),    # x
        ],
        out_specs=pl.BlockSpec((1, H, W, C), lambda bi: (bi, 0, 0, 0)),
        scratch_shapes=[pltpu.VMEM((H + 2, W + 2, C), jnp.float32)],
        compiler_params=pltpu.CompilerParams(
            dimension_semantics=("parallel",),       # v7x: shard batch over 2 TCs
            vmem_limit_bytes=32 * 1024 * 1024,
        ),
    )(w9, b2, x_nhwc)

    return jnp.transpose(out_nhwc, (0, 3, 1, 2))                     # back to NCHW


# ----------------------------------------------------------------------------
# Pure-JAX reference (silent correctness check)
# ----------------------------------------------------------------------------
def dwconv_reference(x, w, b):
    out = lax.conv_general_dilated(
        x, w, window_strides=(1, 1), padding=((1, 1), (1, 1)),
        dimension_numbers=("NCHW", "OIHW", "NCHW"),
        feature_group_count=x.shape[1])
    return out + b[None, :, None, None]


if __name__ == "__main__":
    key = jax.random.PRNGKey(0)
    kx, kw, kb = jax.random.split(key, 3)

    # Small shapes consistent with the module (dim is the channel count; pick
    # C=128 so the lane axis is fully dense, still far smaller than dim=768).
    B, C, H, W = 2, 128, 16, 16
    x = jax.random.normal(kx, (B, C, H, W), jnp.float32)
    # nn.Conv2d(dim, dim, 3, padding=1, groups=dim) -> weight (dim, 1, 3, 3)
    w = 0.1 * jax.random.normal(kw, (C, 1, 3, 3), jnp.float32)
    b = 0.1 * jax.random.normal(kb, (C,), jnp.float32)

    out = dwconv_pallas(x, w, b)
    out = jax.block_until_ready(out)

    ref = dwconv_reference(x, w, b)
    assert out.shape == (B, C, H, W)
    assert np.allclose(np.asarray(out), np.asarray(ref), rtol=1e-4, atol=1e-4)

    print("KERNEL_OK")
</pallas_src>

<mosaic_0001>
module attributes {stable_mosaic.version = 11 : i64} {
  func.func @dwconv_kernel(%arg0: i32, %arg1: memref<9x128xf32, #tpu.memory_space<vmem>>, %arg2: memref<1x128xf32, #tpu.memory_space<vmem>>, %arg3: memref<1x16x16x128xf32, #tpu.memory_space<vmem>>, %arg4: memref<1x16x16x128xf32, #tpu.memory_space<vmem>>, %arg5: memref<18x18x128xf32, #tpu.memory_space<vmem>>) attributes {dimension_semantics = [#tpu.dimension_semantics<parallel>], iteration_bounds = array<i64: 2>, scalar_prefetch = 0 : i64, scratch_operands = 1 : i64, tpu.core_type = #tpu.core_type<tc>, window_params = [{pipeline_mode = #tpu.pipeline_mode<synchronous>, transform_indices = @transform_0, window_bounds = array<i64: 9, 128>}, {pipeline_mode = #tpu.pipeline_mode<synchronous>, transform_indices = @transform_1, window_bounds = array<i64: 1, 128>}, {transform_indices = @transform_2, window_bounds = array<i64: 1, 16, 16, 128>}, {transform_indices = @transform_3, window_bounds = array<i64: 1, 16, 16, 128>}]} {
    %cst = arith.constant 0.000000e+00 : f32
    %0 = vector.broadcast %cst : f32 to vector<18x18x128xf32>
    %c0 = arith.constant 0 : index
    %c0_0 = arith.constant 0 : index
    %c0_1 = arith.constant 0 : index
    %1 = vector.load %arg5[%c0, %c0_0, %c0_1] : memref<18x18x128xf32, #tpu.memory_space<vmem>>, vector<18x18x128xf32>
    tpu.vector_store %arg5[%c0, %c0_0, %c0_1], %0 {strides = array<i32>} : memref<18x18x128xf32, #tpu.memory_space<vmem>>, vector<18x18x128xf32>,
    %c0_2 = arith.constant 0 : index
    %c0_3 = arith.constant 0 : index
    %c0_4 = arith.constant 0 : index
    %c0_5 = arith.constant 0 : index
    %2 = vector.load %arg3[%c0_2, %c0_3, %c0_4, %c0_5] : memref<1x16x16x128xf32, #tpu.memory_space<vmem>>, vector<1x16x16x128xf32>
    %3 = vector.shape_cast %2 : vector<1x16x16x128xf32> to vector<16x16x128xf32>
    %c1 = arith.constant 1 : index
    %c1_6 = arith.constant 1 : index
    %c0_7 = arith.constant 0 : index
    %4 = vector.load %arg5[%c1, %c1_6, %c0_7] : memref<18x18x128xf32, #tpu.memory_space<vmem>>, vector<16x16x128xf32>
    tpu.vector_store %arg5[%c1, %c1_6, %c0_7], %3 {strides = array<i32>} : memref<18x18x128xf32, #tpu.memory_space<vmem>>, vector<16x16x128xf32>,
    %cst_8 = arith.constant 0.000000e+00 : f32
    %5 = vector.broadcast %cst_8 : f32 to vector<16x16x128xf32>
    %c0_9 = arith.constant 0 : index
    %c0_10 = arith.constant 0 : index
    %6 = vector.load %arg2[%c0_9, %c0_10] : memref<1x128xf32, #tpu.memory_space<vmem>>, vector<1x128xf32>
    %7 = vector.shape_cast %6 : vector<1x128xf32> to vector<128xf32>
    %8 = vector.shape_cast %7 : vector<128xf32> to vector<1x1x128xf32>
    %9 = vector.broadcast %8 : vector<1x1x128xf32> to vector<16x16x128xf32>
    %10 = arith.addf %5, %9 : vector<16x16x128xf32>
    %c0_11 = arith.constant 0 : index
    %c0_12 = arith.constant 0 : index
    %c0_13 = arith.constant 0 : index
    %11 = vector.load %arg5[%c0_11, %c0_12, %c0_13] : memref<18x18x128xf32, #tpu.memory_space<vmem>>, vector<16x16x128xf32>
    %c0_14 = arith.constant 0 : index
    %c0_15 = arith.constant 0 : index
    %12 = vector.load %arg1[%c0_14, %c0_15] : memref<9x128xf32, #tpu.memory_space<vmem>>, vector<1x128xf32>
    %13 = vector.shape_cast %12 : vector<1x128xf32> to vector<128xf32>
    %14 = vector.shape_cast %13 : vector<128xf32> to vector<1x1x128xf32>
    %15 = vector.broadcast %14 : vector<1x1x128xf32> to vector<16x16x128xf32>
    %16 = arith.mulf %11, %15 : vector<16x16x128xf32>
    %17 = arith.addf %10, %16 : vector<16x16x128xf32>
    %c0_16 = arith.constant 0 : index
    %c1_17 = arith.constant 1 : index
    %c0_18 = arith.constant 0 : index
    %18 = vector.load %arg5[%c0_16, %c1_17, %c0_18] : memref<18x18x128xf32, #tpu.memory_space<vmem>>, vector<16x16x128xf32>
    %c1_19 = arith.constant 1 : index
    %c0_20 = arith.constant 0 : index
    %19 = vector.load %arg1[%c1_19, %c0_20] : memref<9x128xf32, #tpu.memory_space<vmem>>, vector<1x128xf32>
    %20 = vector.shape_cast %19 : vector<1x128xf32> to vector<128xf32>
    %21 = vector.shape_cast %20 : vector<128xf32> to vector<1x1x128xf32>
    %22 = vector.broadcast %21 : vector<1x1x128xf32> to vector<16x16x128xf32>
    %23 = arith.mulf %18, %22 : vector<16x16x128xf32>
    %24 = arith.addf %17, %23 : vector<16x16x128xf32>
    %c0_21 = arith.constant 0 : index
    %c2 = arith.constant 2 : index
    %c0_22 = arith.constant 0 : index
    %25 = vector.load %arg5[%c0_21, %c2, %c0_22] : memref<18x18x128xf32, #tpu.memory_space<vmem>>, vector<16x16x128xf32>
    %c2_23 = arith.constant 2 : index
    %c0_24 = arith.constant 0 : index
    %26 = vector.load %arg1[%c2_23, %c0_24] : memref<9x128xf32, #tpu.memory_space<vmem>>, vector<1x128xf32>
    %27 = vector.shape_cast %26 : vector<1x128xf32> to vector<128xf32>
    %28 = vector.shape_cast %27 : vector<128xf32> to vector<1x1x128xf32>
    %29 = vector.broadcast %28 : vector<1x1x128xf32> to vector<16x16x128xf32>
    %30 = arith.mulf %25, %29 : vector<16x16x128xf32>
    %31 = arith.addf %24, %30 : vector<16x16x128xf32>
    %c1_25 = arith.constant 1 : index
    %c0_26 = arith.constant 0 : index
    %c0_27 = arith.constant 0 : index
    %32 = vector.load %arg5[%c1_25, %c0_26, %c0_27] : memref<18x18x128xf32, #tpu.memory_space<vmem>>, vector<16x16x128xf32>
    %c3 = arith.constant 3 : index
    %c0_28 = arith.constant 0 : index
    %33 = vector.load %arg1[%c3, %c0_28] : memref<9x128xf32, #tpu.memory_space<vmem>>, vector<1x128xf32>
    %34 = vector.shape_cast %33 : vector<1x128xf32> to vector<128xf32>
    %35 = vector.shape_cast %34 : vector<128xf32> to vector<1x1x128xf32>
    %36 = vector.broadcast %35 : vector<1x1x128xf32> to vector<16x16x128xf32>
    %37 = arith.mulf %32, %36 : vector<16x16x128xf32>
    %38 = arith.addf %31, %37 : vector<16x16x128xf32>
    %c1_29 = arith.constant 1 : index
    %c1_30 = arith.constant 1 : index
    %c0_31 = arith.constant 0 : index
    %39 = vector.load %arg5[%c1_29, %c1_30, %c0_31] : memref<18x18x128xf32, #tpu.memory_space<vmem>>, vector<16x16x128xf32>
    %c4 = arith.constant 4 : index
    %c0_32 = arith.constant 0 : index
    %40 = vector.load %arg1[%c4, %c0_32] : memref<9x128xf32, #tpu.memory_space<vmem>>, vector<1x128xf32>
    %41 = vector.shape_cast %40 : vector<1x128xf32> to vector<128xf32>
    %42 = vector.shape_cast %41 : vector<128xf32> to vector<1x1x128xf32>
    %43 = vector.broadcast %42 : vector<1x1x128xf32> to vector<16x16x128xf32>
    %44 = arith.mulf %39, %43 : vector<16x16x128xf32>
    %45 = arith.addf %38, %44 : vector<16x16x128xf32>
    %c1_33 = arith.constant 1 : index
    %c2_34 = arith.constant 2 : index
    %c0_35 = arith.constant 0 : index
    %46 = vector.load %arg5[%c1_33, %c2_34, %c0_35] : memref<18x18x128xf32, #tpu.memory_space<vmem>>, vector<16x16x128xf32>
    %c5 = arith.constant 5 : index
    %c0_36 = arith.constant 0 : index
    %47 = vector.load %arg1[%c5, %c0_36] : memref<9x128xf32, #tpu.memory_space<vmem>>, vector<1x128xf32>
    %48 = vector.shape_cast %47 : vector<1x128xf32> to vector<128xf32>
    %49 = vector.shape_cast %48 : vector<128xf32> to vector<1x1x128xf32>
    %50 = vector.broadcast %49 : vector<1x1x128xf32> to vector<16x16x128xf32>
    %51 = arith.mulf %46, %50 : vector<16x16x128xf32>
    %52 = arith.addf %45, %51 : vector<16x16x128xf32>
    %c2_37 = arith.constant 2 : index
    %c0_38 = arith.constant 0 : index
    %c0_39 = arith.constant 0 : index
    %53 = vector.load %arg5[%c2_37, %c0_38, %c0_39] : memref<18x18x128xf32, #tpu.memory_space<vmem>>, vector<16x16x128xf32>
    %c6 = arith.constant 6 : index
    %c0_40 = arith.constant 0 : index
    %54 = vector.load %arg1[%c6, %c0_40] : memref<9x128xf32, #tpu.memory_space<vmem>>, vector<1x128xf32>
    %55 = vector.shape_cast %54 : vector<1x128xf32> to vector<128xf32>
    %56 = vector.shape_cast %55 : vector<128xf32> to vector<1x1x128xf32>
    %57 = vector.broadcast %56 : vector<1x1x128xf32> to vector<16x16x128xf32>
    %58 = arith.mulf %53, %57 : vector<16x16x128xf32>
    %59 = arith.addf %52, %58 : vector<16x16x128xf32>
    %c2_41 = arith.constant 2 : index
    %c1_42 = arith.constant 1 : index
    %c0_43 = arith.constant 0 : index
    %60 = vector.load %arg5[%c2_41, %c1_42, %c0_43] : memref<18x18x128xf32, #tpu.memory_space<vmem>>, vector<16x16x128xf32>
    %c7 = arith.constant 7 : index
    %c0_44 = arith.constant 0 : index
    %61 = vector.load %arg1[%c7, %c0_44] : memref<9x128xf32, #tpu.memory_space<vmem>>, vector<1x128xf32>
    %62 = vector.shape_cast %61 : vector<1x128xf32> to vector<128xf32>
    %63 = vector.shape_cast %62 : vector<128xf32> to vector<1x1x128xf32>
    %64 = vector.broadcast %63 : vector<1x1x128xf32> to vector<16x16x128xf32>
    %65 = arith.mulf %60, %64 : vector<16x16x128xf32>
    %66 = arith.addf %59, %65 : vector<16x16x128xf32>
    %c2_45 = arith.constant 2 : index
    %c2_46 = arith.constant 2 : index
    %c0_47 = arith.constant 0 : index
    %67 = vector.load %arg5[%c2_45, %c2_46, %c0_47] : memref<18x18x128xf32, #tpu.memory_space<vmem>>, vector<16x16x128xf32>
    %c8 = arith.constant 8 : index
    %c0_48 = arith.constant 0 : index
    %68 = vector.load %arg1[%c8, %c0_48] : memref<9x128xf32, #tpu.memory_space<vmem>>, vector<1x128xf32>
    %69 = vector.shape_cast %68 : vector<1x128xf32> to vector<128xf32>
    %70 = vector.shape_cast %69 : vector<128xf32> to vector<1x1x128xf32>
    %71 = vector.broadcast %70 : vector<1x1x128xf32> to vector<16x16x128xf32>
    %72 = arith.mulf %67, %71 : vector<16x16x128xf32>
    %73 = arith.addf %66, %72 : vector<16x16x128xf32>
    %c0_49 = arith.constant 0 : index
    %c0_50 = arith.constant 0 : index
    %c0_51 = arith.constant 0 : index
    %c0_52 = arith.constant 0 : index
    %74 = vector.load %arg4[%c0_49, %c0_50, %c0_51, %c0_52] : memref<1x16x16x128xf32, #tpu.memory_space<vmem>>, vector<1x16x16x128xf32>
    %75 = vector.shape_cast %74 : vector<1x16x16x128xf32> to vector<16x16x128xf32>
    %76 = vector.shape_cast %73 : vector<16x16x128xf32> to vector<1x16x16x128xf32>
    tpu.vector_store %arg4[%c0_49, %c0_50, %c0_51, %c0_52], %76 {strides = array<i32>} : memref<1x16x16x128xf32, #tpu.memory_space<vmem>>, vector<1x16x16x128xf32>,
    return
  }
  func.func @transform_0(%arg0: i32) -> (i32, i32) {
    %c0_i32 = arith.constant 0 : i32
    %c0_i32_0 = arith.constant 0 : i32
    %c0_i32_1 = arith.constant 0 : i32
    return %c0_i32, %c0_i32_0 : i32, i32
  }
  func.func @transform_1(%arg0: i32) -> (i32, i32) {
    %c0_i32 = arith.constant 0 : i32
    %c0_i32_0 = arith.constant 0 : i32
    %c0_i32_1 = arith.constant 0 : i32
    return %c0_i32, %c0_i32_0 : i32, i32
  }
  func.func @transform_2(%arg0: i32) -> (i32, i32, i32, i32) {
    %c0_i32 = arith.constant 0 : i32
    %c0_i32_0 = arith.constant 0 : i32
    %c0_i32_1 = arith.constant 0 : i32
    %c0_i32_2 = arith.constant 0 : i32
    return %arg0, %c0_i32, %c0_i32_0, %c0_i32_1 : i32, i32, i32, i32
  }
  func.func @transform_3(%arg0: i32) -> (i32, i32, i32, i32) {
    %c0_i32 = arith.constant 0 : i32
    %c0_i32_0 = arith.constant 0 : i32
    %c0_i32_1 = arith.constant 0 : i32
    %c0_i32_2 = arith.constant 0 : i32
    return %arg0, %c0_i32, %c0_i32_0, %c0_i32_1 : i32, i32, i32, i32
  }
}

</mosaic_0001>

<bundles_post_ra>
// kernel: tpu_custom_call.1
= control target key start
LH: loop header
LB: loop body
LE: loop exit
PB: predicated region body
PF: predicated region fallthrough
CT: control target
= control target key end

     0   :  { %8 = vsyncpa [#allocation4], 0  ;;  %s2470_s0 = inlined_call_operand.hbm [shape: f32[9,128], index: 0, kind: input, shape index: {}]   ;;  %s2471_s1 = inlined_call_operand.hbm [shape: f32[1,128], index: 1, kind: input, shape index: {}]   ;;  %s2472_s2 = inlined_call_operand.hbm [shape: f32[2,16,16,128], index: 2, kind: input, shape index: {}]   ;;  %s2473_s3 = inlined_call_operand.hbm [shape: f32[2,16,16,128], index: 3, kind: output, shape index: {}]  }
   0x1   :  { %9 = vsyncpa [#allocation7], 0 }
   0x2   :  { %10 = vsyncpa [#allocation5], 0 }
   0x3   :  { %12 = vsyncpa [#allocation5 + $0x1], 0  ;;  %s1673_s12 = smov 0   ;;  %s1675_s13 = smov 0  }
   0x4   :  { %s1677_s14 = smov 0   ;;  %s1679_s15 = smov 0  }
   0x5 LB: > { %s1694_s16 = sadd.s32 4294967295, %s1644_s15   ;;  %s1367_s17 = sadd.s32 4294967294, %s1644_s15   ;;  %s1644_s15 = sphi %s1679_s15, %s2502_s15   ;;  %s1640_s14 = sphi %s1677_s14, %s2501_s14   ;;  %s1636_s13 = sphi %s1675_s13, %s2500_s13   ;;  %s1632_s12 = sphi %s1673_s12, %s2499_s12  }
   0x6   : > { %p80_p0 = scmp.ne.s32.totalorder %s1636_s13, %s1632_s12  ;;  %p81_p1 = scmp.eq.s32.totalorder %s1694_s16, 0 }
   0x7   : > { %p104_p2 = scmp.eq.s32.totalorder %s1694_s16, 1  ;;  %p110_p3 = scmp.eq.s32.totalorder %s1367_s17, 1 }
   0x8   : > { %p1703_p4 = por %p81_p1, %p80_p0  ;;  %p1368_p5 = scmp.ge.s32.totalorder %s1644_s15, 1 }
   0x9   : > { %p1708_p6 = por %p110_p3, %p80_p0  ;;  %p117_p7 = scmp.lt.s32.totalorder %s1644_s15, 3 }
   0xa   : > { %s128_s22 = sshll.u32 %s2470_s0, 4  ;;  %s1646_s24 = smov [#allocation3]   ;;  %s129_s22 = int_to_ptr.hbm [resolvable:$true] %s128_s22 }
   0xb   : > { %p1716_p8 = pnand %p1368_p5, %p117_p7  ;;  %s130_s25 = sshll.u32 %s1646_s24, 4  ;;  %s131_s25 = int_to_ptr.vmem [resolvable:$true] %s130_s25 }
   0xc   : > { %s143_s28 = sshll.u32 %s2471_s1, 4  ;;  %s1647_s29 = smov 128   ;;  %s144_s28 = int_to_ptr.hbm [resolvable:$true] %s143_s28 }
   0xd   : > { %p1399_p9 = pneg %p1716_p8  ;;  %s1648_s30 = smov 8  }
   0xe   : > { %s1649_s4 = smov [#allocation6]   ;;  %s1732_s6 = sadd.s32 1, %s1644_s15  }
   0xf   : > { %p1400_p10 = pnand %p1399_p9, %p81_p1  ;;  %s145_s5 = sshll.u32 %s1649_s4, 4  ;;  %s146_s5 = int_to_ptr.vmem [resolvable:$true] %s145_s5 }
  0x10   : > { %s67_s7 = sadd.s32 1, %s1640_s14  ;;  %s64_s8 = ssub.s32 %s1644_s15, %s1732_s6 }
  0x11   : > { %1402 = dma.hbm_to_vmem [thread:$0]  (!%p1400_p10), %s129_s22, 256, %s131_s25, [#allocation4], %s1647_s29, %s1647_s29, %s1648_s30  }
  0x12   : > { %1405 = dma.hbm_to_vmem [thread:$0]  (!%p1400_p10), %s144_s28, 16, %s146_s5, [#allocation7]  }
  0x13   : > { %p74_p12 = scmp.ne.s32.totalorder %s1640_s14, %s1636_s13  ;;  %p65_p13 = scmp.eq.s32.totalorder %s64_s8, 0 }
  0x14   : > { %p75_p0 = scmp.eq.s32.totalorder %s1644_s15, 0  ;;  %p1416_p7 = scmp.lt.s32.totalorder %s1644_s15, 2 }
  0x15   : > { %p1742_p3 = por %p104_p2, %p74_p12  ;;  %s156_s11 = sand.u32 1, %s1644_s15  }
  0x16   : > { %s1747_s10 = scalar_select %p65_p13, %s1640_s14, %s67_s7  }
  0x17   : > { %p76_p5 = por %p75_p0, %p74_p12  ;;  %s158_s17 = sand.u32 1, %s1640_s14  }
  0x18   : > { %s1372_s20 = sshll.u32 %s158_s17, 8  ;;  %s1385_s21 = sshll.u32 %s1644_s15, 8 }
  0x19   : > { %s165_s25 = scalar_lea.hbm %s2472_s2, %s1385_s21  ;;  %s160_s27 = scalar_lea.vmem [#allocation8], %s1372_s20 }
  0x1a   : > { %s166_s26 = sshll.u32 %s165_s25, 4  ;;  %s168_s28 = sshll.u32 %s160_s27, 4  ;;  %s167_s26 = int_to_ptr.hbm [resolvable:$true] %s166_s26  ;;  %s169_s28 = int_to_ptr.vmem [resolvable:$true] %s168_s28 }
  0x1b   : > { %p1756_p2 = pnand %p1416_p7, %p76_p5  ;;  %s157_s5 = scalar_lea.sflag [#allocation4], %s156_s11 }
  0x1c   : > { %s1540_s7 = sshra.s32 %s167_s26, 4  ;;  %s1547_s20 = scalar_lea.hbm %s2472_s2, 512  ;;  %s1541_s7 = int_to_ptr.hbm [resolvable:$true] %s1540_s7 }
  0x1d   : > { %s1542_s8 = scalar_lea.hbm %s1541_s7, 256  ;;  %p1544_p10 = pneg %p1756_p2 }
  0x1e   : > { %p1543_p9 = scmp.ne.s32.totalorder %s1541_s7, %s1542_s8  ;;  %p1548_p0 = scmp.lt.s32.totalorder %s1541_s7, %s2472_s2 }
  0x1f   : > { %p1549_p5 = scmp.lt.s32.totalorder %s1547_s20, %s1542_s8 }
  0x20   : > { %p1545_p12 = pnand %p1544_p10, %p1543_p9 }
  0x21   : > { %p1550_p7 = por %p1549_p5, %p1548_p0 }
  0x22   : > { %p1546_p13 = pneg %p1545_p12 }
  0x24   : > { %p1551_p11 = pnand %p1550_p7, %p1546_p13 }
  0x26   : > { %1554 = shalt.err (!%p1551_p11)
}
  0x27   : > { %1409 = dma.hbm_to_vmem [thread:$0]  (!%p1756_p2), %s167_s26, 4096, %s169_s28, %s157_s5, %s1647_s29, %s1647_s29, %s1648_s30  }
  0x28   : > { %180 = sbr.rel (%p1716_p8) target bundleno = 269 (0x10d), region = 32 }
  0x2d   : > { %1615 = dma.done.wait (%p81_p1), [#allocation4], 256  }
  0x2e   : > { %1617 = vsyncadd (%p81_p1), [#allocation4], 4294967040 }
  0x2f   : > { %1619 = dma.done.wait (%p81_p1), [#allocation7], 16  }
  0x30   : > { %1621 = vsyncadd (%p81_p1), [#allocation7], 4294967280  ;;  %s192_s29 = sand.u32 1, %s1694_s16   ;;  %s194_s30 = sand.u32 1, %s1636_s13  }
  0x31   : > { %s1787_s23 = sshll.u32 %s194_s30, 8  ;;  %s193_s11 = scalar_lea.sflag [#allocation4], %s192_s29 }
  0x32   : > { %s1790_s25 = scalar_lea.vmem [#allocation8], %s1787_s23 }
  0x33   : > { %1623 = dma.done.wait (%p1703_p4), %s193_s11, 4096  }
  0x34   : > { %1625 = vsyncadd (%p1703_p4), %s193_s11, 4294963200  ;;  %v1650_v0 = vmov 0.0   ;;  %v274_v1 = vld [vmem:[%s1790_s25] sm:$0xff]  ;;  %v1797_v2 = vld [vmem:[#allocation3] ss:$0 sm:$0xff]  ;;  %s2065_s18 = scalar_lea.vmem [#allocation9], %s1787_s23 }
  0x35   : > { %220 = vst [vmem:[#allocation2] sm:$0xff] %v1650_v0  ;;  %v275_v3 = vld [vmem:[%s1790_s25 + $0x8] sm:$0xff]  ;;  %v276_v4 = vld [vmem:[%s1790_s25 + $0x10] sm:$0xff]  ;;  %v1802_v5 = vld [vmem:[%s1790_s25 + $0x18] sm:$0xff]  ;;  %v378_v7 = vmul.f32 0.0, %v1797_v2  ;;  %s1386_s26 = sshll.u32 %s1694_s16, 8 }
  0x36   : > { %221 = vst [vmem:[#allocation2 + $0x8] sm:$0xff] %v1650_v0  ;;  %v1804_v6 = vld [vmem:[#allocation6] ss:$0 sm:$0xff]  ;;  %v1807_v10 = vld [vmem:[#allocation3 + $0x1] ss:$0 sm:$0xff]  ;;  %v1812_v13 = vld [vmem:[%s1790_s25 + $0x20] sm:$0xff]  ;;  %s1271_s4 = scalar_lea.hbm %s2473_s3, %s1386_s26 }
  0x37   : > { %222 = vst [vmem:[#allocation2 + $0x10] sm:$0x3] %v1650_v0  ;;  %v1809_v11 = vld [vmem:[#allocation3 + $0x2] ss:$0 sm:$0xff]  ;;  %v410_v14 = vadd.f32 %v1804_v6, %v378_v7  ;;  %v1816_v16 = vld [vmem:[%s1790_s25 + $0x28] sm:$0xff]  ;;  %v1830_v23 = vld [vmem:[%s1790_s25 + $0x38] sm:$0xff]  ;;  %v478_v33 = vmul.f32 %v1807_v10, %v274_v1  ;;  %v1851_v35 = vmul.f32 %v1807_v10, %v275_v3  ;;  %v1895_v54 = vmul.f32 %v1807_v10, %v276_v4 }
  0x38   : > { %223 = vst [vmem:[#allocation2 + $0x18] sm:$0xff] %v1650_v0  ;;  %v1823_v20 = vld [vmem:[%s1790_s25 + $0x30] sm:$0xff]  ;;  %v1836_v27 = vld [vmem:[%s1790_s25 + $0x40] sm:$0xff]  ;;  %v1844_v31 = vld [vmem:[%s1790_s25 + $0x48] sm:$0xff]  ;;  %v1911_v62 = vmul.f32 %v1807_v10, %v1802_v5  ;;  %s1272_s16 = sshll.u32 %s2065_s18, 4  ;;  %s1274_s5 = sshll.u32 %s1271_s4, 4  ;;  %s1273_s16 = int_to_ptr.vmem [resolvable:$true] %s1272_s16  ;;  %s1275_s5 = int_to_ptr.hbm [resolvable:$true] %s1274_s5 }
  0x39   : > { %224 = vst [vmem:[#allocation2 + $0x20] sm:$0xff] %v1650_v0  ;;  %v1825_v21 = vld [vmem:[#allocation3 + $0x4] ss:$0 sm:$0xff]  ;;  %v1832_v25 = vld [vmem:[#allocation3 + $0x3] ss:$0 sm:$0xff]  ;;  %v1858_v37 = vld [vmem:[%s1790_s25 + $0x58] sm:$0xff] }
  0x3a   : > { %225 = vst [vmem:[#allocation2 + $0x28] sm:$0x3] %v1650_v0  ;;  %v770_v28 = vmul.f32 %v1825_v21, %v274_v1  ;;  %v1839_v29 = vld [vmem:[#allocation3 + $0x7] ss:$0 sm:$0xff]  ;;  %v771_v30 = vmul.f32 %v1825_v21, %v275_v3  ;;  %v1848_v34 = vmul.f32 %v1825_v21, %v276_v4  ;;  %v1869_v42 = vmul.f32 %v1825_v21, %v1802_v5  ;;  %v1873_v43 = vld [vmem:[%s1790_s25 + $0x60] sm:$0xff]  ;;  %v1889_v50 = vld [vmem:[%s1790_s25 + $0x68] sm:$0xff] }
  0x3b   : > { %226 = vst [vmem:[#allocation2 + $0x30] sm:$0xff] %v1650_v0  ;;  %v1855_v36 = vld [vmem:[%s1790_s25 + $0x50] sm:$0xff]  ;;  %v1861_v39 = vmul.f32 %v1839_v29, %v276_v4  ;;  %v1865_v41 = vmul.f32 %v1839_v29, %v1802_v5  ;;  %v1881_v48 = vmul.f32 %v1839_v29, %v1812_v13  ;;  %v1885_v49 = vmul.f32 %v1839_v29, %v1816_v16  ;;  %s1260_s7 = scalar_lea.sflag [#allocation5], %s194_s30  ;;  %s1584_s8 = sshra.s32 %s1275_s5, 4  ;;  %s1585_s8 = int_to_ptr.hbm [resolvable:$true] %s1584_s8 }
  0x3c   : > { %227 = vst [vmem:[#allocation2 + $0x38] sm:$0xff] %v1650_v0  ;;  %v1876_v45 = vld [vmem:[#allocation3 + $0x5] ss:$0 sm:$0xff]  ;;  %v1891_v52 = vld [vmem:[#allocation3 + $0x6] ss:$0 sm:$0xff]  ;;  %v1899_v55 = vmul.f32 %v1825_v21, %v1812_v13  ;;  %v1903_v56 = vmul.f32 %v1839_v29, %v1823_v20  ;;  %v1915_v63 = vmul.f32 %v1825_v21, %v1816_v16  ;;  %v1933_v7 = vmul.f32 %v1825_v21, %v1823_v20  ;;  %s1586_s17 = scalar_lea.hbm %s1585_s8, 256  ;;  %p1591_p11 = scmp.lt.s32.totalorder %s1585_s8, %s2473_s3 }
  0x3d   : > { %228 = vst [vmem:[#allocation2 + $0x40] sm:$0x3] %v1650_v0  ;;  %v442_v8 = vld [vmem:[#allocation2 + $0x1] sm:$0xff]  ;;  %v1906_v59 = vld [vmem:[#allocation3 + $0x8] ss:$0 sm:$0xff]  ;;  %p1587_p1 = scmp.ne.s32.totalorder %s1585_s8, %s1586_s17  ;;  %s1590_s22 = scalar_lea.hbm %s2473_s3, 512 }
  0x3e   : > { %229 = vst [vmem:[#allocation2 + $0x48] sm:$0xff] %v1650_v0  ;;  %v540_v9 = vld [vmem:[#allocation2 + $0x2] sm:$0xff]  ;;  %v541_v15 = vld [vmem:[#allocation2 + $0xa] sm:$0xff]  ;;  %v476_v17 = vmul.f32 %v1807_v10, %v442_v8  ;;  %v1937_v8 = vld [vmem:[%s1790_s25 + $0x78] sm:$0xff]  ;;  %p1592_p2 = scmp.lt.s32.totalorder %s1590_s22, %s1586_s17 }
  0x3f   : > { %230 = vst [vmem:[#allocation2 + $0x50] sm:$0xff] %v1650_v0  ;;  %v443_v12 = vld [vmem:[#allocation2 + $0x9] sm:$0xff]  ;;  %v574_v18 = vmul.f32 %v1809_v11, %v540_v9  ;;  %v575_v22 = vmul.f32 %v1809_v11, %v541_v15  ;;  %p1588_p4 = pnand %p1587_p1, %p1742_p3 }
  0x40   : > { %231 = vst [vmem:[#allocation2 + $0x58] sm:$0x3] %v1650_v0  ;;  %v477_v19 = vmul.f32 %v1807_v10, %v443_v12  ;;  %v508_v24 = vadd.f32 %v476_v17, %v410_v14  ;;  %p1593_p9 = por %p1592_p2, %p1591_p11 }
  0x41   : > { %232 = vst [vmem:[#allocation2 + $0x60] sm:$0xff] %v1650_v0  ;;  %p1589_p8 = pneg %p1588_p4 }
  0x42   : > { %233 = vst [vmem:[#allocation2 + $0x68] sm:$0xff] %v1650_v0  ;;  %v509_v26 = vadd.f32 %v477_v19, %v410_v14  ;;  %v606_v32 = vadd.f32 %v574_v18, %v508_v24 }
  0x43   : > { %234 = vst [vmem:[#allocation2 + $0x70] sm:$0x3] %v1650_v0  ;;  %p1594_p10 = pnand %p1593_p9, %p1589_p8 }
  0x44   : > { %235 = vst [vmem:[#allocation2 + $0x78] sm:$0xff] %v1650_v0  ;;  %v607_v40 = vadd.f32 %v575_v22, %v509_v26 }
  0x45   : > { %236 = vst [vmem:[#allocation2 + $0x80] sm:$0xff] %v1650_v0 }
  0x46   : > { %237 = vst [vmem:[#allocation2 + $0x88] sm:$0x3] %v1650_v0 }
  0x47   : > { %238 = vst [vmem:[#allocation2 + $0x90] sm:$0xff] %v1650_v0 }
  0x48   : > { %239 = vst [vmem:[#allocation2 + $0x98] sm:$0xff] %v1650_v0 }
  0x49   : > { %240 = vst [vmem:[#allocation2 + $0xa0] sm:$0x3] %v1650_v0 }
  0x4a   : > { %241 = vst [vmem:[#allocation2 + $0xa8] sm:$0xff] %v1650_v0 }
  0x4b   : > { %242 = vst [vmem:[#allocation2 + $0xb0] sm:$0xff] %v1650_v0 }
  0x4c   : > { %243 = vst [vmem:[#allocation2 + $0xb8] sm:$0x3] %v1650_v0 }
  0x4d   : > { %244 = vst [vmem:[#allocation2 + $0xc0] sm:$0xff] %v1650_v0 }
  0x4e   : > { %245 = vst [vmem:[#allocation2 + $0xc8] sm:$0xff] %v1650_v0 }
  0x4f   : > { %246 = vst [vmem:[#allocation2 + $0xd0] sm:$0x3] %v1650_v0 }
  0x50   : > { %247 = vst [vmem:[#allocation2 + $0xd8] sm:$0xff] %v1650_v0 }
  0x51   : > { %248 = vst [vmem:[#allocation2 + $0xe0] sm:$0xff] %v1650_v0 }
  0x52   : > { %249 = vst [vmem:[#allocation2 + $0xe8] sm:$0x3] %v1650_v0 }
  0x53   : > { %250 = vst [vmem:[#allocation2 + $0xf0] sm:$0xff] %v1650_v0 }
  0x54   : > { %251 = vst [vmem:[#allocation2 + $0xf8] sm:$0xff] %v1650_v0 }
  0x55   : > { %252 = vst [vmem:[#allocation2 + $0x100] sm:$0x3] %v1650_v0 }
  0x56   : > { %253 = vst [vmem:[#allocation2 + $0x108] sm:$0xff] %v1650_v0 }
  0x57   : > { %254 = vst [vmem:[#allocation2 + $0x110] sm:$0xff] %v1650_v0 }
  0x58   : > { %255 = vst [vmem:[#allocation2 + $0x118] sm:$0x3] %v1650_v0 }
  0x59   : > { %256 = vst [vmem:[#allocation2 + $0x120] sm:$0xff] %v1650_v0 }
  0x5a   : > { %257 = vst [vmem:[#allocation2 + $0x128] sm:$0xff] %v1650_v0 }
  0x5b   : > { %258 = vst [vmem:[#allocation2 + $0x130] sm:$0x3] %v1650_v0 }
  0x5c   : > { %259 = vst [vmem:[#allocation2 + $0x138] sm:$0xff] %v1650_v0 }
  0x5d   : > { %260 = vst [vmem:[#allocation2 + $0x140] sm:$0xff] %v1650_v0 }
  0x5e   : > { %261 = vst [vmem:[#allocation2 + $0x148] sm:$0x3] %v1650_v0 }
  0x5f   : > { %262 = vst [vmem:[#allocation2 + $0x150] sm:$0xff] %v1650_v0 }
  0x60   : > { %263 = vst [vmem:[#allocation2 + $0x158] sm:$0xff] %v1650_v0 }
  0x61   : > { %264 = vst [vmem:[#allocation2 + $0x160] sm:$0x3] %v1650_v0 }
  0x62   : > { %265 = vst [vmem:[#allocation2 + $0x168] sm:$0xff] %v1650_v0 }
  0x63   : > { %266 = vst [vmem:[#allocation2 + $0x170] sm:$0xff] %v1650_v0 }
  0x64   : > { %267 = vst [vmem:[#allocation2 + $0x178] sm:$0x3] %v1650_v0 }
  0x65   : > { %268 = vst [vmem:[#allocation2 + $0x180] sm:$0xff] %v1650_v0 }
  0x66   : > { %269 = vst [vmem:[#allocation2 + $0x188] sm:$0xff] %v1650_v0 }
  0x67   : > { %270 = vst [vmem:[#allocation2 + $0x190] sm:$0x3] %v1650_v0 }
  0x68   : > { %271 = vst [vmem:[#allocation2 + $0x198] sm:$0xff] %v1650_v0 }
  0x69   : > { %272 = vst [vmem:[#allocation2 + $0x1a0] sm:$0xff] %v1650_v0 }
  0x6a   : > { %273 = vst [vmem:[#allocation2 + $0x1a8] sm:$0x3] %v1650_v0  ;;  %v1919_v0 = vld [vmem:[%s1790_s25 + $0x70] sm:$0xff] }
  0x6b   : > { %307 = vst [vmem:[#allocation2 + $0x19] sm:$0xff] %v274_v1 }
  0x6c   : > { %308 = vst [vmem:[#allocation2 + $0x21] sm:$0xff] %v275_v3 }
  0x6d   : > { %309 = vst [vmem:[#allocation2 + $0x31] sm:$0xff] %v276_v4  ;;  %v1925_v4 = vmul.f32 %v1839_v29, %v1830_v23 }
  0x6e   : > { %310 = vst [vmem:[#allocation2 + $0x39] sm:$0xff] %v1802_v5  ;;  %v1929_v5 = vmul.f32 %v1807_v10, %v1812_v13 }
  0x6f   : > { %311 = vst [vmem:[#allocation2 + $0x49] sm:$0xff] %v1812_v13  ;;  %v1945_v13 = vld [vmem:[%s1790_s25 + $0x80] sm:$0xff] }
  0x70   : > { %312 = vst [vmem:[#allocation2 + $0x51] sm:$0xff] %v1816_v16 }
  0x71   : > { %313 = vst [vmem:[#allocation2 + $0x61] sm:$0xff] %v1823_v20 }
  0x72   : > { %314 = vst [vmem:[#allocation2 + $0x69] sm:$0xff] %v1830_v23  ;;  %v638_v38 = vld [vmem:[#allocation2 + $0x18] sm:$0xff] }
  0x73   : > { %315 = vst [vmem:[#allocation2 + $0x79] sm:$0xff] %v1836_v27  ;;  %v672_v44 = vmul.f32 %v1832_v25, %v638_v38  ;;  %v639_v46 = vld [vmem:[#allocation2 + $0x20] sm:$0xff]  ;;  %v380_v47 = vmul.f32 %v1797_v2, %v638_v38 }
  0x74   : > { %316 = vst [vmem:[#allocation2 + $0x81] sm:$0xff] %v1844_v31  ;;  %v834_v51 = vld [vmem:[#allocation2 + $0x1a] sm:$0xff]  ;;  %v673_v53 = vmul.f32 %v1832_v25, %v639_v46  ;;  %v933_v58 = vld [vmem:[#allocation2 + $0x30] sm:$0xff]  ;;  %v835_v60 = vld [vmem:[#allocation2 + $0x22] sm:$0xff]  ;;  %v381_v26 = vmul.f32 %v1797_v2, %v639_v46 }
  0x75   : > { %2488 = vst [vmem:[#allocation14_spill] sm:$0xff] %v1889_v50  ;;  %v704_v57 = vadd.f32 %v672_v44, %v606_v32  ;;  %v412_v61 = vadd.f32 %v1804_v6, %v380_v47  ;;  %v1921_v1 = vld [vmem:[#allocation2 + $0x32] sm:$0xff]  ;;  %v868_v12 = vmul.f32 %v1876_v45, %v834_v51  ;;  %v1940_v15 = vld [vmem:[#allocation2 + $0x3a] sm:$0xff]  ;;  %v576_v18 = vmul.f32 %v1809_v11, %v834_v51 }
  0x76   : > { %317 = vst [vmem:[#allocation2 + $0x91] sm:$0xff] %v1855_v36  ;;  %v705_v3 = vadd.f32 %v673_v53, %v607_v40  ;;  %v934_v14 = vld [vmem:[#allocation2 + $0x38] sm:$0xff]  ;;  %v967_v19 = vmul.f32 %v1891_v52, %v933_v58  ;;  %v869_v24 = vmul.f32 %v1876_v45, %v835_v60  ;;  %v674_v40 = vmul.f32 %v1832_v25, %v933_v58  ;;  %v935_v44 = vld [vmem:[#allocation2 + $0x48] sm:$0xff] }
  0x77   : > { %318 = vst [vmem:[#allocation2 + $0x99] sm:$0xff] %v1858_v37  ;;  %v802_v9 = vadd.f32 %v770_v28, %v704_v57  ;;  %v510_v17 = vadd.f32 %v478_v33, %v412_v61  ;;  %v1952_v28 = vld [vmem:[%s1790_s25 + $0x88] sm:$0xff]  ;;  %v1956_v33 = vmul.f32 %v1906_v59, %v1921_v1  ;;  %v292_v46 = vld [vmem:[%s1790_s25 + $0x90] sm:$0xff]  ;;  %v968_v51 = vmul.f32 %v1891_v52, %v934_v14  ;;  %v293_v61 = vld [vmem:[%s1790_s25 + $0x98] sm:$0xff] }
  0x78   : > { %2489 = vst [vmem:[#allocation15_spill] sm:$0xff] %v1919_v0  ;;  %v803_v22 = vadd.f32 %v771_v30, %v705_v3  ;;  %v1959_v30 = vld [vmem:[#allocation2 + $0x4a] sm:$0xff]  ;;  %v1966_v53 = vmul.f32 %v1906_v59, %v1940_v15  ;;  %v413_v57 = vadd.f32 %v1804_v6, %v381_v26 }
  0x79   : > { %319 = vst [vmem:[#allocation2 + $0xa9] sm:$0xff] %v1873_v43  ;;  %v900_v32 = vadd.f32 %v868_v12, %v802_v9  ;;  %v608_v38 = vadd.f32 %v576_v18, %v510_v17  ;;  %v870_v12 = vmul.f32 %v1876_v45, %v1921_v1  ;;  %v1973_v17 = vld [vmem:[#allocation2 + $0x50] sm:$0xff]  ;;  %v382_v18 = vmul.f32 %v1797_v2, %v933_v58 }
  0x7a   : > { %2490 = vst [vmem:[#allocation16_spill] sm:$0xff] %v1937_v8  ;;  %v901_v47 = vadd.f32 %v869_v24, %v803_v22  ;;  %v294_v22 = vld [vmem:[%s1790_s25 + $0xa0] sm:$0xff]  ;;  %v969_v24 = vmul.f32 %v1891_v52, %v935_v44  ;;  %v1981_v26 = vmul.f32 %v1906_v59, %v1959_v30  ;;  %v675_v58 = vmul.f32 %v1832_v25, %v934_v14 }
  0x7b   : > { %320 = vst [vmem:[#allocation2 + $0xb1] sm:$0xff] %v1889_v50  ;;  %v999_v3 = vadd.f32 %v967_v19, %v900_v32  ;;  %v706_v9 = vadd.f32 %v674_v40, %v608_v38  ;;  %v511_v19 = vadd.f32 %v1851_v35, %v413_v57  ;;  %v577_v32 = vmul.f32 %v1809_v11, %v835_v60  ;;  %v295_v38 = vld [vmem:[%s1790_s25 + $0xa8] sm:$0xff] }
  0x7c   : > { %2491 = vst [vmem:[#allocation17_spill] sm:$0xff] %v1945_v13  ;;  %v1000_v40 = vadd.f32 %v968_v51, %v901_v47  ;;  %v871_v35 = vmul.f32 %v1876_v45, %v1940_v15  ;;  %v970_v60 = vmul.f32 %v1891_v52, %v1973_v17 }
  0x7d   : > { %321 = vst [vmem:[#allocation2 + $0xc1] sm:$0xff] %v1919_v0  ;;  %v296_v0 = vld [vmem:[%s1790_s25 + $0xb0] sm:$0xff]  ;;  %v609_v50 = vadd.f32 %v577_v32, %v511_v19  ;;  %v1097_v47 = vadd.f32 %v1861_v39, %v999_v3  ;;  %v2006_v32 = vld [vmem:[#allocation2 + $0x60] sm:$0xff] }
  0x7e   : > { %2492 = vst [vmem:[#allocation18_spill] sm:$0xff] %v1952_v28  ;;  %v300_v3 = vld [vmem:[%s1790_s25 + $0xd0] sm:$0xff] }
  0x7f   : > { %322 = vst [vmem:[#allocation2 + $0xc9] sm:$0xff] %v1937_v8  ;;  %v414_v8 = vadd.f32 %v1804_v6, %v382_v18  ;;  %v707_v18 = vadd.f32 %v675_v58, %v609_v50  ;;  %v872_v50 = vmul.f32 %v1876_v45, %v1959_v30  ;;  %v579_v58 = vmul.f32 %v1809_v11, %v1940_v15 }
  0x80   : > { %323 = vst [vmem:[#allocation2 + $0xd9] sm:$0xff] %v1945_v13  ;;  %v804_v13 = vadd.f32 %v1848_v34, %v706_v9  ;;  %v297_v34 = vld [vmem:[%s1790_s25 + $0xb8] sm:$0xff]  ;;  %v298_v9 = vld [vmem:[%s1790_s25 + $0xc0] sm:$0xff]  ;;  %v677_v15 = vmul.f32 %v1832_v25, %v1973_v17 }
  0x81   : > { %324 = vst [vmem:[#allocation2 + $0xe1] sm:$0xff] %v1952_v28  ;;  %v1988_v28 = vld [vmem:[#allocation2 + $0x52] sm:$0xff]  ;;  %v512_v57 = vadd.f32 %v1895_v54, %v414_v8  ;;  %v299_v54 = vld [vmem:[%s1790_s25 + $0xc8] sm:$0xff] }
  0x82   : > { %325 = vst [vmem:[#allocation2 + $0xf1] sm:$0xff] %v292_v46  ;;  %v383_v46 = vmul.f32 %v1797_v2, %v934_v14  ;;  %v902_v51 = vadd.f32 %v870_v12, %v804_v13  ;;  %v1166_v19 = vmul.f32 %v1906_v59, %v1988_v28  ;;  %v676_v14 = vmul.f32 %v1832_v25, %v935_v44 }
  0x83   : > { %326 = vst [vmem:[#allocation2 + $0xf9] sm:$0xff] %v293_v61  ;;  %v578_v61 = vmul.f32 %v1809_v11, %v1921_v1  ;;  %v1098_v1 = vadd.f32 %v1865_v41, %v1000_v40  ;;  %v805_v12 = vadd.f32 %v1869_v42, %v707_v18  ;;  %v301_v41 = vld [vmem:[%s1790_s25 + $0xd8] sm:$0xff]  ;;  %v304_v18 = vld [vmem:[%s1790_s25 + $0xf0] sm:$0xff] }
  0x84   : > { %327 = vst [vmem:[#allocation2 + $0x109] sm:$0xff] %v294_v22  ;;  %v2008_v22 = vld [vmem:[#allocation2 + $0x62] sm:$0xff]  ;;  %v415_v39 = vadd.f32 %v1804_v6, %v383_v46  ;;  %v1001_v8 = vadd.f32 %v969_v24, %v902_v51  ;;  %v1195_v24 = vadd.f32 %v1956_v33, %v1097_v47  ;;  %v971_v46 = vmul.f32 %v1891_v52, %v2006_v32  ;;  %v303_v47 = vld [vmem:[%s1790_s25 + $0xe8] sm:$0xff] }
  0x85   : > { %328 = vst [vmem:[#allocation2 + $0x111] sm:$0xff] %v295_v38  ;;  %v610_v13 = vadd.f32 %v578_v61, %v512_v57  ;;  %v1167_v42 = vmul.f32 %v1906_v59, %v2008_v22  ;;  %v1196_v57 = vadd.f32 %v1966_v53, %v1098_v1  ;;  %v305_v53 = vld [vmem:[%s1790_s25 + $0xf8] sm:$0xff] }
  0x86   : > { %329 = vst [vmem:[#allocation2 + $0x121] sm:$0xff] %v296_v0  ;;  %v513_v38 = vadd.f32 %v1911_v62, %v415_v39  ;;  %v384_v0 = vmul.f32 %v1797_v2, %v935_v44  ;;  %v302_v62 = vld [vmem:[%s1790_s25 + $0xe0] sm:$0xff]  ;;  %v1099_v61 = vadd.f32 %v1881_v48, %v1001_v8 }
  0x87   : > { %330 = vst [vmem:[#allocation2 + $0x129] sm:$0xff] %v297_v34  ;;  %v708_v40 = vadd.f32 %v676_v14, %v610_v13  ;;  %v903_v34 = vadd.f32 %v871_v35, %v805_v12  ;;  %v2030_v44 = vld [vmem:[#allocation2 + $0x68] sm:$0xff]  ;;  %v873_v35 = vmul.f32 %v1876_v45, %v1988_v28 }
  0x88   : > { %331 = vst [vmem:[#allocation2 + $0x139] sm:$0xff] %v298_v9  ;;  %v611_v51 = vadd.f32 %v579_v58, %v513_v38  ;;  %v416_v33 = vadd.f32 %v1804_v6, %v384_v0  ;;  %v972_v48 = vmul.f32 %v1891_v52, %v2030_v44  ;;  %v1197_v38 = vadd.f32 %v1981_v26, %v1099_v61 }
  0x89   : > { %332 = vst [vmem:[#allocation2 + $0x141] sm:$0xff] %v299_v54  ;;  %v806_v9 = vadd.f32 %v1899_v55, %v708_v40  ;;  %v1002_v14 = vadd.f32 %v970_v60, %v903_v34  ;;  %v2040_v54 = vld [vmem:[#allocation2 + $0x6a] sm:$0xff]  ;;  %v385_v55 = vmul.f32 %v1797_v2, %v1973_v17  ;;  %v483_v60 = vmul.f32 %v1807_v10, %v1816_v16 }
  0x8a   : > { %333 = vst [vmem:[#allocation2 + $0x151] sm:$0xff] %v300_v3  ;;  %v709_v39 = vadd.f32 %v677_v15, %v611_v51  ;;  %v514_v13 = vadd.f32 %v1929_v5, %v416_v33  ;;  %v580_v3 = vmul.f32 %v1809_v11, %v1959_v30  ;;  %v678_v30 = vmul.f32 %v1832_v25, %v2006_v32  ;;  %v1135_v51 = vld [vmem:[#allocation2 + $0x7a] sm:$0xff] }
  0x8b   : > { %334 = vst [vmem:[#allocation2 + $0x159] sm:$0xff] %v301_v41  ;;  %v904_v1 = vadd.f32 %v872_v50, %v806_v9  ;;  %v1100_v8 = vadd.f32 %v1885_v49, %v1002_v14  ;;  %v2056_v50 = vld [vmem:[#allocation2 + $0x78] sm:$0xff]  ;;  %v1168_v17 = vmul.f32 %v1906_v59, %v2040_v54  ;;  %v417_v16 = vadd.f32 %v1804_v6, %v385_v55 }
  0x8c   : > { %335 = vst [vmem:[#allocation2 + $0x169] sm:$0xff] %v302_v62  ;;  %v807_v5 = vadd.f32 %v1915_v63, %v709_v39  ;;  %v612_v12 = vadd.f32 %v580_v3, %v514_v13  ;;  %v874_v63 = vmul.f32 %v1876_v45, %v2008_v22  ;;  %v973_v40 = vmul.f32 %v1891_v52, %v2056_v50  ;;  %v1136_v3 = vld [vmem:[#allocation2 + $0x82] sm:$0xff] }
  0x8d   : > { %336 = vst [vmem:[#allocation2 + $0x171] sm:$0xff] %v303_v47  ;;  %v1003_v58 = vadd.f32 %v971_v46, %v904_v1  ;;  %v1198_v0 = vadd.f32 %v1166_v19, %v1100_v8  ;;  %v515_v46 = vadd.f32 %v483_v60, %v417_v16  ;;  %v581_v19 = vmul.f32 %v1809_v11, %v1988_v28 }
  0x8e   : > { %337 = vst [vmem:[#allocation2 + $0x181] sm:$0xff] %v304_v18  ;;  %v905_v49 = vadd.f32 %v873_v35, %v807_v5  ;;  %v710_v41 = vadd.f32 %v678_v30, %v612_v12  ;;  %v386_v15 = vmul.f32 %v1797_v2, %v2006_v32  ;;  %v679_v47 = vmul.f32 %v1832_v25, %v2030_v44  ;;  %v940_v18 = vld [vmem:[#allocation2 + $0x80] sm:$0xff] }
  0x8f   : > { %338 = vst [vmem:[#allocation2 + $0x189] sm:$0xff] %v305_v53  ;;  %v1101_v26 = vadd.f32 %v1903_v56, %v1003_v58  ;;  %v613_v33 = vadd.f32 %v581_v19, %v515_v46  ;;  %v777_v28 = vmul.f32 %v1825_v21, %v1830_v23  ;;  %v1071_v32 = vmul.f32 %v1839_v29, %v1836_v27 }
  0x90   : > { %1227 = vst [vmem:[%s2065_s18] sm:$0xff] %v1195_v24  ;;  %v1004_v62 = vadd.f32 %v972_v48, %v905_v49  ;;  %v808_v34 = vadd.f32 %v1933_v7, %v710_v41  ;;  %v484_v24 = vmul.f32 %v1807_v10, %v1823_v20  ;;  %v418_v61 = vadd.f32 %v1804_v6, %v386_v15 }
  0x91   : > { %1228 = vst [vmem:[%s2065_s18 + $0x8] sm:$0xff] %v1196_v57  ;;  %v1199_v56 = vadd.f32 %v1167_v42, %v1101_v26  ;;  %v1169_v20 = vmul.f32 %v1906_v59, %v1135_v51  ;;  %v711_v42 = vadd.f32 %v679_v47, %v613_v33  ;;  %v582_v39 = vmul.f32 %v1809_v11, %v2008_v22 }
  0x92   : > { %1229 = vst [vmem:[%s2065_s18 + $0x10] sm:$0xff] %v1197_v38  ;;  %v1102_v57 = vadd.f32 %v1925_v4, %v1004_v62  ;;  %v906_v7 = vadd.f32 %v874_v63, %v808_v34  ;;  %v516_v14 = vadd.f32 %v484_v24, %v418_v61  ;;  %v875_v4 = vmul.f32 %v1876_v45, %v2040_v54 }
  0x93   : > { %1230 = vst [vmem:[%s2065_s18 + $0x18] sm:$0xff] %v1198_v0  ;;  %v809_v13 = vadd.f32 %v777_v28, %v711_v42  ;;  %v387_v53 = vmul.f32 %v1797_v2, %v2030_v44  ;;  %v485_v1 = vmul.f32 %v1807_v10, %v1830_v23  ;;  %v680_v60 = vmul.f32 %v1832_v25, %v2056_v50  ;;  %v941_v44 = vld [vmem:[#allocation2 + $0x90] sm:$0xff]  ;;  %v942_v28 = vld [vmem:[#allocation2 + $0x98] sm:$0xff] }
  0x94   : > { %1231 = vst [vmem:[%s2065_s18 + $0x20] sm:$0xff] %v1199_v56  ;;  %v1200_v9 = vadd.f32 %v1168_v17, %v1102_v57  ;;  %v1005_v35 = vadd.f32 %v973_v40, %v906_v7  ;;  %v614_v55 = vadd.f32 %v582_v39, %v516_v14  ;;  %v778_v22 = vmul.f32 %v1825_v21, %v1836_v27  ;;  %v1137_v0 = vld [vmem:[#allocation2 + $0x92] sm:$0xff] }
  0x95   : > { %v907_v8 = vadd.f32 %v875_v4, %v809_v13  ;;  %v974_v5 = vmul.f32 %v1891_v52, %v940_v18  ;;  %v1072_v12 = vmul.f32 %v1839_v29, %v1844_v31  ;;  %v419_v30 = vadd.f32 %v1804_v6, %v387_v53 }
  0x96   : > { %1232 = vst [vmem:[%s2065_s18 + $0x28] sm:$0xff] %v1200_v9  ;;  %v1103_v48 = vadd.f32 %v1071_v32, %v1005_v35  ;;  %v1170_v38 = vmul.f32 %v1906_v59, %v1136_v3  ;;  %v712_v58 = vadd.f32 %v680_v60, %v614_v55  ;;  %v583_v17 = vmul.f32 %v1809_v11, %v2040_v54 }
  0x97   : > { %v1006_v16 = vadd.f32 %v974_v5, %v907_v8  ;;  %v517_v49 = vadd.f32 %v485_v1, %v419_v30  ;;  %v388_v41 = vmul.f32 %v1797_v2, %v2056_v50  ;;  %v486_v63 = vmul.f32 %v1807_v10, %v1836_v27  ;;  %v1138_v1 = vld [vmem:[#allocation2 + $0x9a] sm:$0xff]  ;;  %v1139_v8 = vld [vmem:[#allocation2 + $0xaa] sm:$0xff] }
  0x98   : > { %v1201_v23 = vadd.f32 %v1169_v20, %v1103_v48  ;;  %v810_v26 = vadd.f32 %v778_v22, %v712_v58  ;;  %v876_v40 = vmul.f32 %v1876_v45, %v1135_v51  ;;  %v975_v46 = vmul.f32 %v1891_v52, %v941_v44  ;;  %v943_v48 = vld [vmem:[#allocation2 + $0xa8] sm:$0xff] }
  0x99   : > { %v681_v19 = vmul.f32 %v1832_v25, %v940_v18  ;;  %v1104_v62 = vadd.f32 %v1072_v12, %v1006_v16  ;;  %v615_v34 = vadd.f32 %v583_v17, %v517_v49  ;;  %v779_v54 = vmul.f32 %v1825_v21, %v1844_v31 }
  0x9a   : > { %1233 = vst [vmem:[%s2065_s18 + $0x30] sm:$0xff] %v1201_v23  ;;  %v420_v15 = vadd.f32 %v1804_v6, %v388_v41  ;;  %v908_v50 = vadd.f32 %v876_v40, %v810_v26  ;;  %v1073_v27 = vmul.f32 %v1839_v29, %v1855_v36  ;;  %v1171_v24 = vmul.f32 %v1906_v59, %v1137_v0  ;;  %v944_v40 = vld [vmem:[#allocation2 + $0xb0] sm:$0xff] }
  0x9b   : > { %v584_v56 = vmul.f32 %v1809_v11, %v1135_v51  ;;  %v1202_v33 = vadd.f32 %v1170_v38, %v1104_v62  ;;  %v713_v47 = vadd.f32 %v681_v19, %v615_v34  ;;  %v389_v7 = vmul.f32 %v1797_v2, %v940_v18 }
  0x9c   : > { %v518_v57 = vadd.f32 %v486_v63, %v420_v15  ;;  %v1007_v32 = vadd.f32 %v975_v46, %v908_v50  ;;  %v877_v61 = vmul.f32 %v1876_v45, %v1136_v3  ;;  %v682_v20 = vmul.f32 %v1832_v25, %v941_v44 }
  0x9d   : > { %v487_v42 = vmul.f32 %v1807_v10, %v1844_v31  ;;  %1234 = vst [vmem:[%s2065_s18 + $0x38] sm:$0xff] %v1202_v33  ;;  %v811_v9 = vadd.f32 %v779_v54, %v713_v47  ;;  %v780_v51 = vmul.f32 %v1825_v21, %v1855_v36  ;;  %v421_v14 = vadd.f32 %v1804_v6, %v389_v7  ;;  %v2493_v7 = vld [vmem:[#allocation14_spill] sm:$0xff] }
  0x9e   : > { %v616_v35 = vadd.f32 %v584_v56, %v518_v57  ;;  %v1105_v39 = vadd.f32 %v1073_v27, %v1007_v32  ;;  %v976_v13 = vmul.f32 %v1891_v52, %v942_v28  ;;  %v1074_v18 = vmul.f32 %v1839_v29, %v1858_v37  ;;  %v1140_v32 = vld [vmem:[#allocation2 + $0xb2] sm:$0xff] }
  0x9f   : > { %v878_v4 = vmul.f32 %v1876_v45, %v1137_v0  ;;  %v909_v53 = vadd.f32 %v877_v61, %v811_v9  ;;  %v519_v55 = vadd.f32 %v487_v42, %v421_v14  ;;  %v585_v60 = vmul.f32 %v1809_v11, %v1136_v3  ;;  %v945_v42 = vld [vmem:[#allocation2 + $0xc0] sm:$0xff] }
  0xa0   : > { %v714_v31 = vadd.f32 %v682_v20, %v616_v35  ;;  %v1203_v22 = vadd.f32 %v1171_v24, %v1105_v39  ;;  %v683_v5 = vmul.f32 %v1832_v25, %v942_v28  ;;  %v390_v12 = vmul.f32 %v1797_v2, %v941_v44  ;;  %v1141_v39 = vld [vmem:[#allocation2 + $0xc2] sm:$0xff] }
  0xa1   : > { %v488_v30 = vmul.f32 %v1807_v10, %v1855_v36  ;;  %v1008_v23 = vadd.f32 %v976_v13, %v909_v53  ;;  %v617_v58 = vadd.f32 %v585_v60, %v519_v55  ;;  %v781_v17 = vmul.f32 %v1825_v21, %v1858_v37 }
  0xa2   : > { %v812_v38 = vadd.f32 %v780_v51, %v714_v31  ;;  %1235 = vst [vmem:[%s2065_s18 + $0x40] sm:$0xff] %v1203_v22  ;;  %v1172_v16 = vmul.f32 %v1906_v59, %v1138_v1  ;;  %v977_v3 = vmul.f32 %v1891_v52, %v943_v48  ;;  %v1075_v49 = vmul.f32 %v1839_v29, %v1873_v43 }
  0xa3   : > { %v422_v41 = vadd.f32 %v1804_v6, %v390_v12  ;;  %v1106_v44 = vadd.f32 %v1074_v18, %v1008_v23  ;;  %v1173_v36 = vmul.f32 %v1906_v59, %v1139_v8  ;;  %v715_v26 = vadd.f32 %v683_v5, %v617_v58  ;;  %v2494_v12 = vld [vmem:[#allocation15_spill] sm:$0xff] }
  0xa4   : > { %v910_v63 = vadd.f32 %v878_v4, %v812_v38  ;;  %v586_v19 = vmul.f32 %v1809_v11, %v1137_v0  ;;  %v391_v62 = vmul.f32 %v1797_v2, %v942_v28  ;;  %v489_v34 = vmul.f32 %v1807_v10, %v1858_v37  ;;  %v946_v58 = vld [vmem:[#allocation2 + $0xc8] sm:$0xff] }
  0xa5   : > { %v520_v46 = vadd.f32 %v488_v30, %v422_v41  ;;  %v1204_v54 = vadd.f32 %v1172_v16, %v1106_v44  ;;  %v813_v50 = vadd.f32 %v781_v17, %v715_v26  ;;  %v879_v27 = vmul.f32 %v1876_v45, %v1138_v1 }
  0xa6   : > { %v1009_v15 = vadd.f32 %v977_v3, %v910_v63  ;;  %v684_v56 = vmul.f32 %v1832_v25, %v943_v48  ;;  %v782_v33 = vmul.f32 %v1825_v21, %v1873_v43  ;;  %v423_v47 = vadd.f32 %v1804_v6, %v391_v62 }
  0xa7   : > { %v618_v24 = vadd.f32 %v586_v19, %v520_v46  ;;  %1236 = vst [vmem:[%s2065_s18 + $0x48] sm:$0xff] %v1204_v54  ;;  %v911_v57 = vadd.f32 %v879_v27, %v813_v50  ;;  %v978_v28 = vmul.f32 %v1891_v52, %v944_v40  ;;  %v1076_v37 = vmul.f32 %v1839_v29, %v2493_v7 }
  0xa8   : > { %v1107_v0 = vadd.f32 %v1075_v49, %v1009_v15  ;;  %v880_v20 = vmul.f32 %v1876_v45, %v1139_v8  ;;  %v521_v9 = vadd.f32 %v489_v34, %v423_v47  ;;  %v587_v35 = vmul.f32 %v1809_v11, %v1138_v1  ;;  %v2495_v34 = vld [vmem:[#allocation16_spill] sm:$0xff]  ;;  %v1142_v15 = vld [vmem:[#allocation2 + $0xca] sm:$0xff] }
  0xa9   : > { %v716_v61 = vadd.f32 %v684_v56, %v618_v24  ;;  %v1010_v14 = vadd.f32 %v978_v28, %v911_v57  ;;  %v392_v13 = vmul.f32 %v1797_v2, %v943_v48  ;;  %v490_v18 = vmul.f32 %v1807_v10, %v1873_v43  ;;  %v947_v24 = vld [vmem:[#allocation2 + $0xd8] sm:$0xff] }
  0xaa   : > { %v1205_v51 = vadd.f32 %v1173_v36, %v1107_v0  ;;  %v619_v53 = vadd.f32 %v587_v35, %v521_v9  ;;  %v685_v31 = vmul.f32 %v1832_v25, %v944_v40  ;;  %v783_v55 = vmul.f32 %v1825_v21, %v2493_v7  ;;  %v2196_v57 = vld [vmem:[#allocation2 + $0xda] sm:$0xff] }
  0xab   : > { %v814_v4 = vadd.f32 %v782_v33, %v716_v61  ;;  %v1108_v60 = vadd.f32 %v1076_v37, %v1010_v14  ;;  %v1174_v22 = vmul.f32 %v1906_v59, %v1140_v32  ;;  %v979_v1 = vmul.f32 %v1891_v52, %v945_v42 }
  0xac   : > { %1237 = vst [vmem:[%s2065_s18 + $0x50] sm:$0xff] %v1205_v51  ;;  %v424_v5 = vadd.f32 %v1804_v6, %v392_v13  ;;  %v1077_v43 = vmul.f32 %v1839_v29, %v2494_v12  ;;  %v1175_v30 = vmul.f32 %v1906_v59, %v1141_v39  ;;  %v717_v23 = vadd.f32 %v685_v31, %v619_v53  ;;  %v2496_v13 = vld [vmem:[#allocation17_spill] sm:$0xff]  ;;  %v459_v31 = vld [vmem:[#allocation2 + $0xc9] sm:$0xff] }
  0xad   : > { %v912_v48 = vadd.f32 %v880_v20, %v814_v4  ;;  %v1206_v38 = vadd.f32 %v1174_v22, %v1108_v60  ;;  %v588_v16 = vmul.f32 %v1809_v11, %v1139_v8  ;;  %v393_v3 = vmul.f32 %v1797_v2, %v944_v40  ;;  %v948_v60 = vld [vmem:[#allocation2 + $0xe0] sm:$0xff] }
  0xae   : > { %v522_v17 = vadd.f32 %v490_v18, %v424_v5  ;;  %v815_v41 = vadd.f32 %v783_v55, %v717_v23  ;;  %v881_v44 = vmul.f32 %v1876_v45, %v1140_v32  ;;  %v491_v63 = vmul.f32 %v1807_v10, %v2493_v7  ;;  %v1144_v23 = vld [vmem:[#allocation2 + $0xe2] sm:$0xff] }
  0xaf   : > { %v1011_v49 = vadd.f32 %v979_v1, %v912_v48  ;;  %1238 = vst [vmem:[%s2065_s18 + $0x58] sm:$0xff] %v1206_v38  ;;  %v686_v26 = vmul.f32 %v1832_v25, %v945_v42  ;;  %v784_v46 = vmul.f32 %v1825_v21, %v2494_v12  ;;  %v425_v19 = vadd.f32 %v1804_v6, %v393_v3 }
  0xb0   : > { %v620_v36 = vadd.f32 %v588_v16, %v522_v17  ;;  %v913_v8 = vadd.f32 %v881_v44, %v815_v41  ;;  %v980_v40 = vmul.f32 %v1891_v52, %v946_v58  ;;  %v1078_v54 = vmul.f32 %v1839_v29, %v2495_v34  ;;  %v2497_v41 = vld [vmem:[#allocation18_spill] sm:$0xff] }
  0xb1   : > { %v1109_v62 = vadd.f32 %v1077_v43, %v1011_v49  ;;  %v882_v27 = vmul.f32 %v1876_v45, %v1141_v39  ;;  %v523_v56 = vadd.f32 %v491_v63, %v425_v19  ;;  %v589_v33 = vmul.f32 %v1809_v11, %v1140_v32  ;;  %v460_v19 = vld [vmem:[#allocation2 + $0xd9] sm:$0xff] }
  0xb2   : > { %v718_v50 = vadd.f32 %v686_v26, %v620_v36  ;;  %v1012_v0 = vadd.f32 %v980_v40, %v913_v8  ;;  %v394_v28 = vmul.f32 %v1797_v2, %v945_v42  ;;  %v492_v7 = vmul.f32 %v1807_v10, %v2494_v12  ;;  %v949_v36 = vld [vmem:[#allocation2 + $0xf0] sm:$0xff] }
  0xb3   : > { %v1207_v47 = vadd.f32 %v1175_v30, %v1109_v62  ;;  %v621_v61 = vadd.f32 %v589_v33, %v523_v56  ;;  %v687_v20 = vmul.f32 %v1832_v25, %v946_v58  ;;  %v785_v9 = vmul.f32 %v1825_v21, %v2495_v34  ;;  %v1047_v34 = vld [vmem:[#allocation2 + $0xf1] sm:$0xff] }
  0xb4   : > { %v816_v37 = vadd.f32 %v784_v46, %v718_v50  ;;  %v1110_v35 = vadd.f32 %v1078_v54, %v1012_v0  ;;  %v1176_v32 = vmul.f32 %v1906_v59, %v1142_v15  ;;  %v981_v51 = vmul.f32 %v1891_v52, %v947_v24  ;;  %v753_v54 = vld [vmem:[#allocation2 + $0xe1] sm:$0xff] }
  0xb5   : > { %1239 = vst [vmem:[%s2065_s18 + $0x60] sm:$0xff] %v1207_v47  ;;  %v426_v14 = vadd.f32 %v1804_v6, %v394_v28  ;;  %v1079_v18 = vmul.f32 %v1839_v29, %v2496_v13  ;;  %v1177_v4 = vmul.f32 %v1906_v59, %v2196_v57  ;;  %v719_v53 = vadd.f32 %v687_v20, %v621_v61  ;;  %v1145_v28 = vld [vmem:[#allocation2 + $0xf2] sm:$0xff] }
  0xb6   : > { %v914_v42 = vadd.f32 %v882_v27, %v816_v37  ;;  %v1208_v55 = vadd.f32 %v1176_v32, %v1110_v35  ;;  %v590_v1 = vmul.f32 %v1809_v11, %v1141_v39  ;;  %v395_v5 = vmul.f32 %v1797_v2, %v946_v58  ;;  %v950_v32 = vld [vmem:[#allocation2 + $0xf8] sm:$0xff] }
  0xb7   : > { %v524_v22 = vadd.f32 %v492_v7, %v426_v14  ;;  %v817_v12 = vadd.f32 %v785_v9, %v719_v53  ;;  %v883_v43 = vmul.f32 %v1876_v45, %v1142_v15  ;;  %v688_v30 = vmul.f32 %v1832_v25, %v947_v24 }
  0xb8   : > { %v1013_v48 = vadd.f32 %v981_v51, %v914_v42  ;;  %1240 = vst [vmem:[%s2065_s18 + $0x68] sm:$0xff] %v1208_v55  ;;  %v786_v17 = vmul.f32 %v1825_v21, %v2496_v13  ;;  %v427_v16 = vadd.f32 %v1804_v6, %v395_v5  ;;  %v493_v3 = vmul.f32 %v1807_v10, %v459_v31  ;;  %v1048_v51 = vld [vmem:[#allocation2 + $0xf9] sm:$0xff] }
  0xb9   : > { %v622_v38 = vadd.f32 %v590_v1, %v524_v22  ;;  %v915_v39 = vadd.f32 %v883_v43, %v817_v12  ;;  %v982_v58 = vmul.f32 %v1891_v52, %v948_v60  ;;  %v1080_v44 = vmul.f32 %v1839_v29, %v2497_v41  ;;  %v1146_v55 = vld [vmem:[#allocation2 + $0xfa] sm:$0xff]  ;;  %v1049_v41 = vld [vmem:[#allocation2 + $0x109] sm:$0xff] }
  0xba   : > { %v1111_v49 = vadd.f32 %v1079_v18, %v1013_v48  ;;  %v525_v26 = vadd.f32 %v493_v3, %v427_v16  ;;  %v591_v46 = vmul.f32 %v1809_v11, %v1142_v15  ;;  %v1178_v40 = vmul.f32 %v1906_v59, %v1144_v23 }
  0xbb   : > { %v720_v63 = vadd.f32 %v688_v30, %v622_v38  ;;  %v1014_v8 = vadd.f32 %v982_v58, %v915_v39  ;;  %v396_v50 = vmul.f32 %v1797_v2, %v947_v24  ;;  %v884_v56 = vmul.f32 %v1876_v45, %v2196_v57 }
  0xbc   : > { %v1209_v62 = vadd.f32 %v1177_v4, %v1111_v49  ;;  %v623_v33 = vadd.f32 %v591_v46, %v525_v26  ;;  %v689_v47 = vmul.f32 %v1832_v25, %v948_v60  ;;  %v983_v15 = vmul.f32 %v1891_v52, %v949_v36 }
  0xbd   : > { %v818_v27 = vadd.f32 %v786_v17, %v720_v63  ;;  %v1112_v0 = vadd.f32 %v1080_v44, %v1014_v8  ;;  %v428_v7 = vadd.f32 %v1804_v6, %v396_v50  ;;  %v494_v37 = vmul.f32 %v1807_v10, %v460_v19  ;;  %v951_v17 = vld [vmem:[#allocation2 + $0x108] sm:$0xff] }
  0xbe   : > { %1241 = vst [vmem:[%s2065_s18 + $0x70] sm:$0xff] %v1209_v62  ;;  %v1081_v24 = vmul.f32 %v1839_v29, %v1047_v34  ;;  %v721_v20 = vadd.f32 %v689_v47, %v623_v33  ;;  %v787_v9 = vmul.f32 %v1825_v21, %v753_v54  ;;  %v592_v42 = vmul.f32 %v1809_v11, %v2196_v57  ;;  %v952_v47 = vld [vmem:[#allocation2 + $0x110] sm:$0xff] }
  0xbf   : > { %v916_v61 = vadd.f32 %v884_v56, %v818_v27  ;;  %v1210_v35 = vadd.f32 %v1178_v40, %v1112_v0  ;;  %v526_v14 = vadd.f32 %v494_v37, %v428_v7  ;;  %v397_v13 = vmul.f32 %v1797_v2, %v948_v60  ;;  %v1147_v40 = vld [vmem:[#allocation2 + $0x10a] sm:$0xff] }
  0xc0   : > { %v1179_v4 = vmul.f32 %v1906_v59, %v1145_v28  ;;  %v819_v53 = vadd.f32 %v787_v9, %v721_v20  ;;  %v885_v31 = vmul.f32 %v1876_v45, %v1144_v23  ;;  %v690_v1 = vmul.f32 %v1832_v25, %v949_v36  ;;  %v1050_v0 = vld [vmem:[#allocation2 + $0x111] sm:$0xff] }
  0xc1   : > { %v1015_v18 = vadd.f32 %v983_v15, %v916_v61  ;;  %1242 = vst [vmem:[%s2065_s18 + $0x78] sm:$0xff] %v1210_v35  ;;  %v624_v22 = vadd.f32 %v592_v42, %v526_v14  ;;  %v429_v5 = vadd.f32 %v1804_v6, %v397_v13  ;;  %v495_v48 = vmul.f32 %v1807_v10, %v753_v54  ;;  %v2264_v9 = vld [vmem:[#allocation2 + $0x112] sm:$0xff] }
  0xc2   : > { %v917_v43 = vadd.f32 %v885_v31, %v819_v53  ;;  %v984_v57 = vmul.f32 %v1891_v52, %v950_v32  ;;  %v1082_v60 = vmul.f32 %v1839_v29, %v1048_v51  ;;  %v788_v38 = vmul.f32 %v1825_v21, %v1047_v34  ;;  %v953_v31 = vld [vmem:[#allocation2 + $0x120] sm:$0xff] }
  0xc3   : > { %v1113_v12 = vadd.f32 %v1081_v24, %v1015_v18  ;;  %v722_v30 = vadd.f32 %v690_v1, %v624_v22  ;;  %v527_v16 = vadd.f32 %v495_v48, %v429_v5  ;;  %v593_v3 = vmul.f32 %v1809_v11, %v1144_v23 }
  0xc4   : > { %v1016_v39 = vadd.f32 %v984_v57, %v917_v43  ;;  %v1180_v58 = vmul.f32 %v1906_v59, %v1146_v55  ;;  %v398_v44 = vmul.f32 %v1797_v2, %v949_v36  ;;  %v886_v26 = vmul.f32 %v1876_v45, %v1145_v28 }
  0xc5   : > { %v1211_v49 = vadd.f32 %v1179_v4, %v1113_v12  ;;  %v820_v63 = vadd.f32 %v788_v38, %v722_v30  ;;  %v625_v46 = vadd.f32 %v593_v3, %v527_v16  ;;  %v691_v19 = vmul.f32 %v1832_v25, %v950_v32  ;;  %v2284_v16 = vld [vmem:[#allocation6] ss:$0 sm:$0xff] }
  0xc6   : > { %v1114_v62 = vadd.f32 %v1082_v60, %v1016_v39  ;;  %v985_v8 = vmul.f32 %v1891_v52, %v951_v17  ;;  %v430_v23 = vadd.f32 %v1804_v6, %v398_v44  ;;  %v496_v54 = vmul.f32 %v1807_v10, %v1047_v34 }
  0xc7   : > { %1243 = vst [vmem:[%s2065_s18 + $0x80] sm:$0xff] %v1211_v49  ;;  %v918_v50 = vadd.f32 %v886_v26, %v820_v63  ;;  %v1083_v27 = vmul.f32 %v1839_v29, %v1049_v41  ;;  %v723_v36 = vadd.f32 %v691_v19, %v625_v46  ;;  %v789_v56 = vmul.f32 %v1825_v21, %v1048_v51  ;;  %v2287_v49 = vld [vmem:[#allocation3 + $0x1] ss:$0 sm:$0xff]  ;;  %v954_v26 = vld [vmem:[#allocation2 + $0x128] sm:$0xff] }
  0xc8   : > { %v1212_v33 = vadd.f32 %v1180_v58, %v1114_v62  ;;  %v528_v15 = vadd.f32 %v496_v54, %v430_v23  ;;  %v594_v7 = vmul.f32 %v1809_v11, %v1145_v28  ;;  %v399_v37 = vmul.f32 %v1797_v2, %v950_v32  ;;  %v2293_v46 = vld [vmem:[#allocation2 + $0x129] sm:$0xff]  ;;  %v2295_v62 = vld [vmem:[#allocation3 + $0x2] ss:$0 sm:$0xff] }
  0xc9   : > { %v1017_v61 = vadd.f32 %v985_v8, %v918_v50  ;;  %v1181_v24 = vmul.f32 %v1906_v59, %v1147_v40  ;;  %v821_v20 = vadd.f32 %v789_v56, %v723_v36  ;;  %v887_v34 = vmul.f32 %v1876_v45, %v1146_v55  ;;  %v2305_v36 = vld [vmem:[#allocation3 + $0x3] ss:$0 sm:$0xff] }
  0xca   : > { %1244 = vst [vmem:[%s2065_s18 + $0x88] sm:$0xff] %v1212_v33  ;;  %v626_v35 = vadd.f32 %v594_v7, %v528_v15  ;;  %v692_v14 = vmul.f32 %v1832_v25, %v951_v17  ;;  %v431_v42 = vadd.f32 %v1804_v6, %v399_v37  ;;  %v497_v13 = vmul.f32 %v1807_v10, %v1048_v51  ;;  %v2275_v10 = vld [vmem:[#allocation2 + $0x121] sm:$0xff]  ;;  %v2277_v51 = vld [vmem:[#allocation3] ss:$0 sm:$0xff]  ;;  %v2311_v37 = vld [vmem:[#allocation3 + $0x7] ss:$0 sm:$0xff] }
  0xcb   : > { %v1115_v18 = vadd.f32 %v1083_v27, %v1017_v61  ;;  %v919_v28 = vadd.f32 %v887_v34, %v821_v20  ;;  %v986_v2 = vmul.f32 %v1891_v52, %v952_v47  ;;  %v1084_v32 = vmul.f32 %v1839_v29, %v1050_v0  ;;  %v955_v34 = vld [vmem:[#allocation2 + $0x138] sm:$0xff] }
  0xcc   : > { %v724_v4 = vadd.f32 %v692_v14, %v626_v35  ;;  %v790_v53 = vmul.f32 %v1825_v21, %v1049_v41  ;;  %v529_v22 = vadd.f32 %v497_v13, %v431_v42  ;;  %v595_v1 = vmul.f32 %v1809_v11, %v1146_v55  ;;  %v1149_v55 = vld [vmem:[#allocation2 + $0x122] sm:$0xff] }
  0xcd   : > { %v1213_v5 = vadd.f32 %v1181_v24, %v1115_v18  ;;  %v1018_v48 = vadd.f32 %v986_v2, %v919_v28  ;;  %v1182_v6 = vmul.f32 %v1906_v59, %v2264_v9  ;;  %v400_v12 = vmul.f32 %v2277_v51, %v951_v17  ;;  %v2315_v24 = vld [vmem:[#allocation3 + $0x4] ss:$0 sm:$0xff]  ;;  %v1053_v18 = vld [vmem:[#allocation2 + $0x139] sm:$0xff] }
  0xce   : > { %v822_v43 = vadd.f32 %v790_v53, %v724_v4  ;;  %v888_v57 = vmul.f32 %v1876_v45, %v1147_v40  ;;  %v627_v60 = vadd.f32 %v595_v1, %v529_v22  ;;  %v693_v30 = vmul.f32 %v1832_v25, %v952_v47 }
  0xcf   : > { %1245 = vst [vmem:[%s2065_s18 + $0x90] sm:$0xff] %v1213_v5  ;;  %v1116_v38 = vadd.f32 %v1084_v32, %v1018_v48  ;;  %v987_v11 = vmul.f32 %v1891_v52, %v953_v31  ;;  %v432_v3 = vadd.f32 %v2284_v16, %v400_v12  ;;  %v498_v39 = vmul.f32 %v2287_v49, %v1049_v41  ;;  %v2324_v32 = vld [vmem:[#allocation3 + $0x5] ss:$0 sm:$0xff]  ;;  %v1151_v5 = vld [vmem:[#allocation2 + $0x13a] sm:$0xff] }
  0xd0   : > { %v920_v17 = vadd.f32 %v888_v57, %v822_v43  ;;  %v1085_v58 = vmul.f32 %v1839_v29, %v2275_v10  ;;  %v725_v44 = vadd.f32 %v693_v30, %v627_v60  ;;  %v791_v25 = vmul.f32 %v1825_v21, %v1050_v0  ;;  %v2303_v21 = vld [vmem:[#allocation2 + $0x12a] sm:$0xff]  ;;  %v956_v60 = vld [vmem:[#allocation2 + $0x140] sm:$0xff] }
  0xd1   : > { %v1214_v63 = vadd.f32 %v1182_v6, %v1116_v38  ;;  %v530_v19 = vadd.f32 %v498_v39, %v432_v3  ;;  %v596_v8 = vmul.f32 %v2295_v62, %v1147_v40  ;;  %v401_v23 = vmul.f32 %v2277_v51, %v952_v47  ;;  %v1054_v30 = vld [vmem:[#allocation2 + $0x141] sm:$0xff]  ;;  %v2338_v39 = vld [vmem:[#allocation3 + $0x8] ss:$0 sm:$0xff] }
  0xd2   : > { %v1019_v41 = vadd.f32 %v987_v11, %v920_v17  ;;  %v1183_v54 = vmul.f32 %v1906_v59, %v1149_v55  ;;  %v823_v50 = vadd.f32 %v791_v25, %v725_v44  ;;  %v889_v29 = vmul.f32 %v1876_v45, %v2264_v9  ;;  %v1152_v44 = vld [vmem:[#allocation2 + $0x142] sm:$0xff] }
  0xd3   : > { %1246 = vst [vmem:[%s2065_s18 + $0x98] sm:$0xff] %v1214_v63  ;;  %v628_v27 = vadd.f32 %v596_v8, %v530_v19  ;;  %v694_v56 = vmul.f32 %v2305_v36, %v953_v31  ;;  %v433_v33 = vadd.f32 %v2284_v16, %v401_v23  ;;  %v499_v40 = vmul.f32 %v2287_v49, %v1050_v0  ;;  %v2348_v23 = vld [vmem:[#allocation3 + $0x6] ss:$0 sm:$0xff] }
  0xd4   : > { %v1117_v47 = vadd.f32 %v1085_v58, %v1019_v41  ;;  %v921_v15 = vadd.f32 %v889_v29, %v823_v50  ;;  %v988_v7 = vmul.f32 %v1891_v52, %v954_v26  ;;  %v1086_v45 = vmul.f32 %v2311_v37, %v2293_v46 }
  0xd5   : > { %v726_v61 = vadd.f32 %v694_v56, %v628_v27  ;;  %v792_v20 = vmul.f32 %v2315_v24, %v2275_v10  ;;  %v531_v35 = vadd.f32 %v499_v40, %v433_v33  ;;  %v597_v0 = vmul.f32 %v2295_v62, %v2264_v9  ;;  %v957_v27 = vld [vmem:[#allocation2 + $0x150] sm:$0xff] }
  0xd6   : > { %v1215_v14 = vadd.f32 %v1183_v54, %v1117_v47  ;;  %v1020_v42 = vadd.f32 %v988_v7, %v921_v15  ;;  %v1184_v13 = vmul.f32 %v1906_v59, %v2303_v21  ;;  %v402_v28 = vmul.f32 %v2277_v51, %v953_v31  ;;  %v1055_v15 = vld [vmem:[#allocation2 + $0x151] sm:$0xff] }
  0xd7   : > { %v824_v2 = vadd.f32 %v792_v20, %v726_v61  ;;  %v890_v4 = vmul.f32 %v2324_v32, %v1149_v55  ;;  %v629_v53 = vadd.f32 %v597_v0, %v531_v35  ;;  %v695_v22 = vmul.f32 %v2305_v36, %v954_v26 }
  0xd8   : > { %1247 = vst [vmem:[%s2065_s18 + $0xa0] sm:$0xff] %v1215_v14  ;;  %v1118_v1 = vadd.f32 %v1086_v45, %v1020_v42  ;;  %v989_v9 = vmul.f32 %v1891_v52, %v955_v34  ;;  %v434_v48 = vadd.f32 %v2284_v16, %v402_v28  ;;  %v500_v59 = vmul.f32 %v2287_v49, %v2275_v10  ;;  %v1153_v42 = vld [vmem:[#allocation2 + $0x152] sm:$0xff] }
  0xd9   : > { %v922_v31 = vadd.f32 %v890_v4, %v824_v2  ;;  %v1087_v6 = vmul.f32 %v2311_v37, %v1053_v18  ;;  %v727_v12 = vadd.f32 %v695_v22, %v629_v53  ;;  %v793_v43 = vmul.f32 %v2315_v24, %v2293_v46  ;;  %v958_v22 = vld [vmem:[#allocation2 + $0x158] sm:$0xff] }
  0xda   : > { %v1216_v57 = vadd.f32 %v1184_v13, %v1118_v1  ;;  %v532_v38 = vadd.f32 %v500_v59, %v434_v48  ;;  %v598_v52 = vmul.f32 %v2295_v62, %v1149_v55  ;;  %v403_v11 = vmul.f32 %v2277_v51, %v954_v26  ;;  %v1056_v1 = vld [vmem:[#allocation2 + $0x159] sm:$0xff] }
  0xdb   : > { %v1021_v3 = vadd.f32 %v989_v9, %v922_v31  ;;  %v1185_v10 = vmul.f32 %v2338_v39, %v1151_v5  ;;  %v825_v17 = vadd.f32 %v793_v43, %v727_v12  ;;  %v891_v58 = vmul.f32 %v2324_v32, %v2303_v21  ;;  %v1154_v43 = vld [vmem:[#allocation2 + $0x15a] sm:$0xff] }
  0xdc   : > { %1248 = vst [vmem:[%s2065_s18 + $0xa8] sm:$0xff] %v1216_v57  ;;  %v630_v25 = vadd.f32 %v598_v52, %v532_v38  ;;  %v696_v63 = vmul.f32 %v2305_v36, %v955_v34  ;;  %v435_v19 = vadd.f32 %v2284_v16, %v403_v11  ;;  %v501_v55 = vmul.f32 %v2287_v49, %v2293_v46 }
  0xdd   : > { %v1119_v26 = vadd.f32 %v1087_v6, %v1021_v3  ;;  %v923_v8 = vadd.f32 %v891_v58, %v825_v17  ;;  %v990_v41 = vmul.f32 %v2348_v23, %v956_v60  ;;  %v1088_v54 = vmul.f32 %v2311_v37, %v1054_v30 }
  0xde   : > { %v728_v50 = vadd.f32 %v696_v63, %v630_v25  ;;  %v794_v29 = vmul.f32 %v2315_v24, %v1053_v18  ;;  %v533_v56 = vadd.f32 %v501_v55, %v435_v19  ;;  %v599_v33 = vmul.f32 %v2295_v62, %v2303_v21  ;;  %v959_v25 = vld [vmem:[#allocation2 + $0x168] sm:$0xff] }
  0xdf   : > { %v1217_v40 = vadd.f32 %v1185_v10, %v1119_v26  ;;  %v1022_v47 = vadd.f32 %v990_v41, %v923_v8  ;;  %v1186_v46 = vmul.f32 %v2338_v39, %v1152_v44  ;;  %v404_v7 = vmul.f32 %v2277_v51, %v955_v34  ;;  %v1057_v41 = vld [vmem:[#allocation2 + $0x169] sm:$0xff] }
  0xe0   : > { %v826_v45 = vadd.f32 %v794_v29, %v728_v50  ;;  %v892_v61 = vmul.f32 %v2324_v32, %v1151_v5  ;;  %v631_v20 = vadd.f32 %v599_v33, %v533_v56  ;;  %v697_v35 = vmul.f32 %v2305_v36, %v956_v60 }
  0xe1   : > { %1249 = vst [vmem:[%s2065_s18 + $0xb0] sm:$0xff] %v1217_v40  ;;  %v1120_v0 = vadd.f32 %v1088_v54, %v1022_v47  ;;  %v991_v14 = vmul.f32 %v2348_v23, %v957_v27  ;;  %v436_v21 = vadd.f32 %v2284_v16, %v404_v7  ;;  %v502_v13 = vmul.f32 %v2287_v49, %v1053_v18  ;;  %v1155_v47 = vld [vmem:[#allocation2 + $0x16a] sm:$0xff] }
  0xe2   : > { %v924_v28 = vadd.f32 %v892_v61, %v826_v45  ;;  %v1089_v2 = vmul.f32 %v2311_v37, %v1055_v15  ;;  %v729_v34 = vadd.f32 %v697_v35, %v631_v20  ;;  %v795_v4 = vmul.f32 %v2315_v24, %v1054_v30  ;;  %v960_v35 = vld [vmem:[#allocation2 + $0x170] sm:$0xff] }
  0xe3   : > { %v1218_v53 = vadd.f32 %v1186_v46, %v1120_v0  ;;  %v534_v9 = vadd.f32 %v502_v13, %v436_v21  ;;  %v600_v48 = vmul.f32 %v2295_v62, %v1151_v5  ;;  %v405_v59 = vmul.f32 %v2277_v51, %v956_v60  ;;  %v1058_v0 = vld [vmem:[#allocation2 + $0x171] sm:$0xff] }
  0xe4   : > { %v1023_v31 = vadd.f32 %v991_v14, %v924_v28  ;;  %v1187_v6 = vmul.f32 %v2338_v39, %v1153_v42  ;;  %v827_v12 = vadd.f32 %v795_v4, %v729_v34  ;;  %v893_v18 = vmul.f32 %v2324_v32, %v1152_v44  ;;  %v1156_v4 = vld [vmem:[#allocation2 + $0x172] sm:$0xff] }
  0xe5   : > { %1250 = vst [vmem:[%s2065_s18 + $0xb8] sm:$0xff] %v1218_v53  ;;  %v632_v57 = vadd.f32 %v600_v48, %v534_v9  ;;  %v698_v38 = vmul.f32 %v2305_v36, %v957_v27  ;;  %v437_v52 = vadd.f32 %v2284_v16, %v405_v59  ;;  %v503_v11 = vmul.f32 %v2287_v49, %v1054_v30 }
  0xe6   : > { %v1121_v3 = vadd.f32 %v1089_v2, %v1023_v31  ;;  %v925_v10 = vadd.f32 %v893_v18, %v827_v12  ;;  %v992_v5 = vmul.f32 %v2348_v23, %v958_v22  ;;  %v1090_v60 = vmul.f32 %v2311_v37, %v1056_v1 }
  0xe7   : > { %v730_v17 = vadd.f32 %v698_v38, %v632_v57  ;;  %v796_v58 = vmul.f32 %v2315_v24, %v1055_v15  ;;  %v535_v63 = vadd.f32 %v503_v11, %v437_v52  ;;  %v601_v19 = vmul.f32 %v2295_v62, %v1152_v44  ;;  %v961_v57 = vld [vmem:[#allocation2 + $0x180] sm:$0xff] }
  0xe8   : > { %v1219_v55 = vadd.f32 %v1187_v6, %v1121_v3  ;;  %v1024_v26 = vadd.f32 %v992_v5, %v925_v10  ;;  %v1188_v8 = vmul.f32 %v2338_v39, %v1154_v43  ;;  %v406_v30 = vmul.f32 %v2277_v51, %v957_v27 }
  0xe9   : > { %v828_v54 = vadd.f32 %v796_v58, %v730_v17  ;;  %v894_v50 = vmul.f32 %v2324_v32, %v1153_v42  ;;  %v633_v29 = vadd.f32 %v601_v19, %v535_v63  ;;  %v699_v56 = vmul.f32 %v2305_v36, %v958_v22 }
  0xea   : > { %1251 = vst [vmem:[%s2065_s18 + $0xc0] sm:$0xff] %v1219_v55  ;;  %v1122_v33 = vadd.f32 %v1090_v60, %v1024_v26  ;;  %v993_v40 = vmul.f32 %v2348_v23, %v959_v25  ;;  %v438_v44 = vadd.f32 %v2284_v16, %v406_v30  ;;  %v504_v46 = vmul.f32 %v2287_v49, %v1055_v15  ;;  %v1059_v55 = vld [vmem:[#allocation2 + $0x181] sm:$0xff] }
  0xeb   : > { %v926_v7 = vadd.f32 %v894_v50, %v828_v54  ;;  %v1091_v45 = vmul.f32 %v2311_v37, %v1057_v41  ;;  %v731_v27 = vadd.f32 %v699_v56, %v633_v29  ;;  %v797_v61 = vmul.f32 %v2315_v24, %v1056_v1  ;;  %v1157_v30 = vld [vmem:[#allocation2 + $0x182] sm:$0xff] }
  0xec   : > { %v1220_v20 = vadd.f32 %v1188_v8, %v1122_v33  ;;  %v536_v14 = vadd.f32 %v504_v46, %v438_v44  ;;  %v602_v21 = vmul.f32 %v2295_v62, %v1153_v42  ;;  %v407_v13 = vmul.f32 %v2277_v51, %v958_v22  ;;  %v962_v56 = vld [vmem:[#allocation2 + $0x188] sm:$0xff] }
  0xed   : > { %v1025_v28 = vadd.f32 %v993_v40, %v926_v7  ;;  %v1189_v2 = vmul.f32 %v2338_v39, %v1155_v47  ;;  %v829_v34 = vadd.f32 %v797_v61, %v731_v27  ;;  %v895_v15 = vmul.f32 %v2324_v32, %v1154_v43  ;;  %v1060_v61 = vld [vmem:[#allocation2 + $0x189] sm:$0xff] }
  0xee   : > { %1252 = vst [vmem:[%s2065_s18 + $0xc8] sm:$0xff] %v1220_v20  ;;  %v634_v53 = vadd.f32 %v602_v21, %v536_v14  ;;  %v700_v9 = vmul.f32 %v2305_v36, %v959_v25  ;;  %v439_v48 = vadd.f32 %v2284_v16, %v407_v13  ;;  %v505_v59 = vmul.f32 %v2287_v49, %v1056_v1 }
  0xef   : > { %v1123_v31 = vadd.f32 %v1091_v45, %v1025_v28  ;;  %v927_v6 = vadd.f32 %v895_v15, %v829_v34  ;;  %v994_v42 = vmul.f32 %v2348_v23, %v960_v35  ;;  %v1092_v22 = vmul.f32 %v2311_v37, %v1058_v0 }
  0xf0   : > { %v732_v12 = vadd.f32 %v700_v9, %v634_v53  ;;  %v798_v18 = vmul.f32 %v2315_v24, %v1057_v41  ;;  %v537_v38 = vadd.f32 %v505_v59, %v439_v48  ;;  %v603_v52 = vmul.f32 %v2295_v62, %v1154_v43 }
  0xf1   : > { %v1221_v11 = vadd.f32 %v1189_v2, %v1123_v31  ;;  %v1026_v3 = vadd.f32 %v994_v42, %v927_v6  ;;  %v1190_v10 = vmul.f32 %v2338_v39, %v1156_v4  ;;  %v408_v1 = vmul.f32 %v2277_v51, %v959_v25  ;;  %v1479_v31 = vld [vmem:[#allocation2] sm:$0xff] }
  0xf2   : > { %v830_v5 = vadd.f32 %v798_v18, %v732_v12  ;;  %v896_v60 = vmul.f32 %v2324_v32, %v1155_v47  ;;  %v635_v17 = vadd.f32 %v603_v52, %v537_v38  ;;  %v701_v58 = vmul.f32 %v2305_v36, %v960_v35  ;;  %v1159_v38 = vld [vmem:[#allocation2 + $0x19a] sm:$0xff] }
  0xf3   : > { %1253 = vst [vmem:[%s2065_s18 + $0xd0] sm:$0xff] %v1221_v11  ;;  %v1124_v63 = vadd.f32 %v1092_v22, %v1026_v3  ;;  %v995_v19 = vmul.f32 %v2348_v23, %v961_v57  ;;  %v440_v26 = vadd.f32 %v2284_v16, %v408_v1  ;;  %v506_v43 = vmul.f32 %v2287_v49, %v1057_v41  ;;  %v1062_v52 = vld [vmem:[#allocation2 + $0x1a1] sm:$0xff] }
  0xf4   : > { %v928_v8 = vadd.f32 %v896_v60, %v830_v5  ;;  %v733_v54 = vadd.f32 %v701_v58, %v635_v17  ;;  %v799_v25 = vmul.f32 %v2315_v24, %v1058_v0  ;;  %v604_v50 = vmul.f32 %v2295_v62, %v1155_v47  ;;  %v1160_v60 = vld [vmem:[#allocation2 + $0x1a2] sm:$0xff] }
  0xf5   : > { %v1222_v29 = vadd.f32 %v1190_v10, %v1124_v63  ;;  %v538_v33 = vadd.f32 %v506_v43, %v440_v26  ;;  %v702_v40 = vmul.f32 %v2305_v36, %v961_v57  ;;  %v409_v44 = vmul.f32 %v2277_v51, %v960_v35  ;;  %v1158_v35 = vld [vmem:[#allocation2 + $0x18a] sm:$0xff] }
  0xf6   : > { %v1027_v46 = vadd.f32 %v995_v19, %v928_v8  ;;  %v1093_v7 = vmul.f32 %v2311_v37, %v1059_v55  ;;  %v831_v45 = vadd.f32 %v799_v25, %v733_v54  ;;  %v897_v41 = vmul.f32 %v2324_v32, %v1156_v4 }
  0xf7   : > { %1254 = vst [vmem:[%s2065_s18 + $0xd8] sm:$0xff] %v1222_v29  ;;  %v1191_v27 = vmul.f32 %v2338_v39, %v1157_v30  ;;  %v636_v20 = vadd.f32 %v604_v50, %v538_v33  ;;  %v441_v47 = vadd.f32 %v2284_v16, %v409_v44  ;;  %v507_v14 = vmul.f32 %v2287_v49, %v1058_v0  ;;  %v1061_v49 = vld [vmem:[#allocation2 + $0x199] sm:$0xff] }
  0xf8   : > { %v1125_v21 = vadd.f32 %v1093_v7, %v1027_v46  ;;  %v929_v13 = vadd.f32 %v897_v41, %v831_v45  ;;  %v996_v28 = vmul.f32 %v2348_v23, %v962_v56  ;;  %v800_v51 = vmul.f32 %v2315_v24, %v1059_v55 }
  0xf9   : > { %v734_v2 = vadd.f32 %v702_v40, %v636_v20  ;;  %v539_v34 = vadd.f32 %v507_v14, %v441_v47  ;;  %v605_v15 = vmul.f32 %v2295_v62, %v1156_v4  ;;  %v703_v53 = vmul.f32 %v2305_v36, %v962_v56 }
  0xfa   : > { %v1223_v9 = vadd.f32 %v1191_v27, %v1125_v21  ;;  %v1028_v48 = vadd.f32 %v996_v28, %v929_v13  ;;  %v1094_v16 = vmul.f32 %v2311_v37, %v1060_v61  ;;  %v898_v59 = vmul.f32 %v2324_v32, %v1157_v30 }
  0xfb   : > { %v832_v0 = vadd.f32 %v800_v51, %v734_v2  ;;  %v997_v6 = vmul.f32 %v1479_v31, %v2348_v23  ;;  %v637_v42 = vadd.f32 %v605_v15, %v539_v34  ;;  %v1192_v62 = vmul.f32 %v2338_v39, %v1158_v35 }
  0xfc   : > { %1255 = vst [vmem:[%s2065_s18 + $0xe0] sm:$0xff] %v1223_v9  ;;  %v1126_v22 = vadd.f32 %v1094_v16, %v1028_v48  ;;  %v1095_v36 = vmul.f32 %v2311_v37, %v1061_v49  ;;  %v801_v18 = vmul.f32 %v2315_v24, %v1060_v61  ;;  %v899_v3 = vmul.f32 %v2324_v32, %v1158_v35 }
  0xfd   : > { %v930_v4 = vadd.f32 %v898_v59, %v832_v0  ;;  %v735_v12 = vadd.f32 %v703_v53, %v637_v42  ;;  %v1193_v24 = vmul.f32 %v2338_v39, %v1159_v38  ;;  %v1096_v5 = vmul.f32 %v2311_v37, %v1062_v52 }
  0xfe   : > { %v1224_v57 = vadd.f32 %v1192_v62, %v1126_v22  ;;  %v1194_v63 = vmul.f32 %v2338_v39, %v1160_v60 }
  0xff   : > { %v1029_v11 = vadd.f32 %v997_v6, %v930_v4  ;;  %v833_v23 = vadd.f32 %v801_v18, %v735_v12 }
 0x100   : > { %1256 = vst [vmem:[%s2065_s18 + $0xe8] sm:$0xff] %v1224_v57 }
 0x101   : > { %v1127_v10 = vadd.f32 %v1095_v36, %v1029_v11  ;;  %v931_v1 = vadd.f32 %v899_v3, %v833_v23 }
 0x103   : > { %v1225_v17 = vadd.f32 %v1193_v24, %v1127_v10  ;;  %v1030_v58 = vadd.f32 %v997_v6, %v931_v1 }
 0x105   : > { %1257 = vst [vmem:[%s2065_s18 + $0xf0] sm:$0xff] %v1225_v17  ;;  %v1128_v32 = vadd.f32 %v1096_v5, %v1030_v58 }
 0x107   : > { %v1226_v19 = vadd.f32 %v1194_v63, %v1128_v32 }
 0x109   : > { %1258 = vst [vmem:[%s2065_s18 + $0xf8] sm:$0xff] %v1226_v19 }
 0x10a   : > { %1597 = shalt.err (!%p1594_p10)
}
 0x10b   : > { %s1651_s30 = smov 128   ;;  %s1652_s23 = smov 8  }
 0x10c   : > { %1397 = dma.vmem_to_hbm [thread:$0]  (%p1742_p3), %s1273_s16, 4096, %s1275_s5, %s1260_s7, %s1651_s30, %s1651_s30, %s1652_s23  }
 0x10d PF: > { %s1289_s11 = sand.u32 1, %s1632_s12   ;;  %p2498_p12 = scmp.ge.s32.totalorder %s1644_s15, 2 }
 0x10e   : > { %s1290_s25 = scalar_lea.sflag [#allocation5], %s1289_s11 }
 0x10f   : > { %p1411_p13 = pnand %p2498_p12, %p1708_p6 }
 0x111   : > { %p1412_p0 = pneg %p1411_p13 }
 0x113   : > { %1627 = dma.done.wait (%p1412_p0), %s1290_s25, 4096  }
 0x114   : > { %1629 = vsyncadd (%p1412_p0), %s1290_s25, 4294963200  ;;  %p15_p5 = scmp.ge.s32.totalorder %s1732_s6, 4   ;;  %s2499_s12 = smov %s1636_s13 }
 0x115   : > { %s2500_s13 = smov %s1640_s14  ;;  %s2501_s14 = smov %s1747_s10 }
 0x116   : > { %s2502_s15 = smov %s1732_s6  ;;  %17 = sbr.rel (!%p15_p5) target bundleno = 5 (0x5), region = 86 }
 0x11b   :  { %1296 = vsyncpa [#allocation4], 1 }
 0x11c   :  { %1298 = vsyncpa [#allocation4 + $0x1], 1 }
 0x11d   :  { %1299 = vsyncpa [#allocation7], 1 }
 0x11e   :  { %1300 = vsyncpa [#allocation5], 1 }
 0x11f   :  { %1302 = vsyncpa [#allocation5 + $0x1], 1 }

</bundles_post_ra>
